<compile_context>
chip_gen: v5e
topology: v5e:2x2
jax: 0.10.0
libtpu: 0.0.40
codegen_flags: <defaults>
</compile_context>

<pallas_src>
import functools
import numpy as np
import jax
import jax.numpy as jnp
from jax.experimental import pallas as pl
from jax.experimental.pallas import tpu as pltpu

# ---------------- small, module-consistent configuration ----------------
B = 2              # batch
IMG = 16           # spatial resolution (stands in for dino.img_resolution = 224)
PATCH = 4          # patch size (stands in for 16)
L = (IMG // PATCH) ** 2   # tokens per hook = 16
BL = B * L
D = 32             # embed_dim (stands in for 384)
N_HOOKS = 5        # hooks [2, 5, 8, 11] + hook_patch
NUM_CLASSES = 16   # stands in for 1000
W_DIM = 32         # mapping w_dim (stands in for 512) -> c_dim seen by heads
CMAP_DIM = 64
MAP_LAYERS = 8
VIRTUAL_BS = 8
BN_EPS = 1e-5
LRELU = 0.2
K9 = 9
PP = 3 * PATCH * PATCH

IMAGENET_MEAN = np.array([0.485, 0.456, 0.406], np.float32)
IMAGENET_STD = np.array([0.229, 0.224, 0.225], np.float32)


# ---------------- kernel ----------------
def _lrelu(x):
    return jnp.where(x >= 0, x, LRELU * x)


def _bn_local(x2, gamma, beta, groups):
    # BatchNormLocal: per-channel stats over (batch-within-group, L); rows of x2 are
    # (b, l)-ordered so one group is a contiguous block of rows.  Biased variance,
    # eps inside rsqrt, per-channel affine — all in f32.
    # TODO(synk): when B is not a multiple of the group count PyTorch splits the batch
    # dim unevenly (e.g. 8+4); this even reshape diverges there (exact for B=2 here).
    r, d = x2.shape
    xg = x2.reshape(groups, r // groups, d)
    mean = jnp.mean(xg, axis=1, keepdims=True)
    var = jnp.mean(jnp.square(xg - mean), axis=1, keepdims=True)   # unbiased=False
    y = (xg - mean) * jax.lax.rsqrt(var + BN_EPS)
    return (y * gamma + beta).reshape(r, d)


def _head_kernel(patches_ref, scale_ref, shift_ref, we_ref, be_ref,
                 wh_ref, bh_ref, cw_ref,
                 w1_ref, b1_ref, g1_ref, bt1_ref,
                 w2_ref, b2_ref, g2_ref, bt2_ref,
                 wc_ref, bc_ref, wm_ref, bm_ref,
                 out_ref, *, groups):
    # --- "DINO" feature stand-in (fused into the head grid so feats never hit HBM).
    # TODO(synk): the pretrained timm ViT-S/16 DINO backbone cannot be reproduced without
    # its checkpoint; it is stood in by this deterministic patch-embed + per-hook linear.
    # (x+1)/2 and ImageNet mean/std normalization are folded into scale/shift.
    xp = patches_ref[...] * scale_ref[...] + shift_ref[...]                     # (BL, PP) f32
    tok = jnp.dot(xp.astype(jnp.bfloat16), we_ref[...],
                  preferred_element_type=jnp.float32) + be_ref[...]             # (BL, D)
    x2 = jnp.dot(tok.astype(jnp.bfloat16), wh_ref[0],
                 preferred_element_type=jnp.float32) + bh_ref[0]                # (BL, D)

    # --- block 1: SpectralConv1d(k=1) + BatchNormLocal + LeakyReLU(0.2)
    y2 = jnp.dot(x2.astype(jnp.bfloat16), w1_ref[0],
                 preferred_element_type=jnp.float32) + b1_ref[0]
    y2 = _lrelu(_bn_local(y2, g1_ref[0], bt1_ref[0], groups))

    # --- residual block: circular k=9 conv = 9 static circular shifts along L
    #     concatenated on channels + ONE fused (BL, 9*D) @ (9*D, D) matmul.
    y3 = y2.reshape(B, L, D)
    pad = K9 // 2
    taps = []
    for t in range(K9):
        s = (pad - t) % L                 # roll so tap t sees y[(l + t - pad) % L]
        if s == 0:
            taps.append(y3)
        else:
            taps.append(jnp.concatenate([y3[:, L - s:, :], y3[:, :L - s, :]], axis=1))
    ycat = jnp.concatenate(taps, axis=-1).reshape(BL, K9 * D)                   # (BL, 9D)
    z2 = jnp.dot(ycat.astype(jnp.bfloat16), w2_ref[0],
                 preferred_element_type=jnp.float32) + b2_ref[0]
    z2 = _lrelu(_bn_local(z2, g2_ref[0], bt2_ref[0], groups))
    h2 = (z2 + y2) * np.float32(1.0 / np.sqrt(2.0))                             # Residual

    # --- cls conv (k=1) and conditional projection with cmapper(w)
    out2 = jnp.dot(h2.astype(jnp.bfloat16), wc_ref[0],
                   preferred_element_type=jnp.float32) + bc_ref[0]              # (BL, M)
    cmap = jnp.dot(cw_ref[...].astype(jnp.bfloat16), wm_ref[0],
                   preferred_element_type=jnp.float32) + bm_ref[0]              # (B, M)
    # per-batch broadcast of cmap to every token (VPU, no matmul / row-select constant)
    cmap_rows = jnp.broadcast_to(cmap[:, None, :], (B, L, CMAP_DIM)).reshape(BL, CMAP_DIM)
    proj = jnp.sum(out2 * cmap_rows, axis=-1) * np.float32(1.0 / np.sqrt(CMAP_DIM))
    out_ref[...] = proj.reshape(1, 1, BL)      # lane-dense per-hook logit row


# ---------------- glue: parameters, wrapper ----------------
def extract_patches(x):
    b, ch, h, w = x.shape
    gh, gw = h // PATCH, w // PATCH
    x = x.reshape(b, ch, gh, PATCH, gw, PATCH)
    x = jnp.transpose(x, (0, 2, 4, 1, 3, 5))          # (b, gh, gw, ch, ph, pw)
    return x.reshape(b * gh * gw, ch * PATCH * PATCH)


def init_params(seed=0):
    rng = np.random.default_rng(seed)
    p = {}
    # synthetic DINO stand-in; preprocessing affine folded per column
    p["feat_scale"] = jnp.asarray(np.repeat(0.5 / IMAGENET_STD, PATCH * PATCH)[None, :], jnp.float32)
    p["feat_shift"] = jnp.asarray(
        np.repeat((0.5 - IMAGENET_MEAN) / IMAGENET_STD, PATCH * PATCH)[None, :], jnp.float32)
    p["feat_we"] = jnp.asarray(rng.standard_normal((PP, D)) / np.sqrt(PP), jnp.bfloat16)
    p["feat_be"] = jnp.zeros((1, D), jnp.float32)
    p["feat_wh"] = jnp.asarray(rng.standard_normal((N_HOOKS, D, D)) / np.sqrt(D), jnp.bfloat16)
    p["feat_bh"] = jnp.asarray(0.01 * rng.standard_normal((N_HOOKS, 1, D)), jnp.float32)
    # mapping network (effective = weight * lr_mult / sqrt(fan_in), bias init 0)
    p["map_we"] = jnp.asarray(rng.standard_normal((NUM_CLASSES, W_DIM)) / np.sqrt(NUM_CLASSES), jnp.float32)
    p["map_be"] = jnp.zeros((1, W_DIM), jnp.float32)
    p["map_lw"] = jnp.asarray(rng.standard_normal((MAP_LAYERS, W_DIM, W_DIM)) / np.sqrt(W_DIM), jnp.float32)
    p["map_lb"] = jnp.zeros((MAP_LAYERS, 1, W_DIM), jnp.float32)

    def spectral_norm(w):
        # TODO(synk): torch.nn.utils.spectral_norm runs one power-iteration per forward;
        # the exact SVD at init is the deterministic stand-in.
        sigma = np.linalg.svd(w.reshape(w.shape[0], -1), compute_uv=False)[0]
        return (w / (sigma + 1e-12)).astype(np.float32)

    w1s, b1s, w2s, b2s, wcs, bcs, wms, bms = ([] for _ in range(8))
    for _ in range(N_HOOKS):
        w1 = spectral_norm(rng.standard_normal((D, D, 1)).astype(np.float32))       # conv k=1
        w2 = spectral_norm(rng.standard_normal((D, D, K9)).astype(np.float32))      # conv k=9
        wc = spectral_norm(rng.standard_normal((CMAP_DIM, D, 1)).astype(np.float32))
        wm = rng.standard_normal((CMAP_DIM, W_DIM)).astype(np.float32)              # cmapper
        w1s.append(w1[:, :, 0].T)                                                   # (in, out)
        # fused k=9 weight: taps stacked on the contraction axis -> (9*in, out)
        w2s.append(np.concatenate([w2[:, :, t].T for t in range(K9)], axis=0))
        wcs.append(wc[:, :, 0].T)                                                   # (D, M)
        wms.append((wm * np.float32(1.0 / np.sqrt(W_DIM))).T)                       # (C, M)
        b1s.append(0.01 * rng.standard_normal((1, D)))
        b2s.append(0.01 * rng.standard_normal((1, D)))
        bcs.append(0.01 * rng.standard_normal((1, CMAP_DIM)))
        bms.append(np.zeros((1, CMAP_DIM)))
    p["h_w1"] = jnp.asarray(np.stack(w1s), jnp.bfloat16)
    p["h_b1"] = jnp.asarray(np.stack(b1s), jnp.float32)
    p["h_g1"] = jnp.ones((N_HOOKS, 1, D), jnp.float32)       # BatchNormLocal affine init
    p["h_beta1"] = jnp.zeros((N_HOOKS, 1, D), jnp.float32)
    p["h_w2"] = jnp.asarray(np.stack(w2s), jnp.bfloat16)     # (N_HOOKS, 9*D, D)
    p["h_b2"] = jnp.asarray(np.stack(b2s), jnp.float32)
    p["h_g2"] = jnp.ones((N_HOOKS, 1, D), jnp.float32)
    p["h_beta2"] = jnp.zeros((N_HOOKS, 1, D), jnp.float32)
    p["h_wc"] = jnp.asarray(np.stack(wcs), jnp.bfloat16)
    p["h_bc"] = jnp.asarray(np.stack(bcs), jnp.float32)
    p["h_wm"] = jnp.asarray(np.stack(wms), jnp.bfloat16)
    p["h_bm"] = jnp.asarray(np.stack(bms), jnp.float32)
    return p


def projected_discriminator_forward(params, x, c):
    # x: (B, 3, IMG, IMG) in [-1, 1] (NCHW); c: (B, 1) int32 class labels
    c = jnp.squeeze(c, axis=1)
    # TODO(synk): RandomCrop / p_crop branch skipped (stochastic; only triggers when
    #             x.size(-1) > img_resolution, which never holds at this resolution).
    patches = extract_patches(x)                                  # (BL, PP) glue reshape only
    onehot = jax.nn.one_hot(c, NUM_CLASSES, dtype=jnp.float32)

    # StyleGAN2 MappingNetwork(z_dim=0): 2 rows of work -> plain XLA (fusing it into the
    # Pallas grid buys nothing at B=2 and would just add launch/prologue overhead).
    w = onehot @ params["map_we"] + params["map_be"]
    w = w * jax.lax.rsqrt(jnp.mean(w * w, axis=-1, keepdims=True) + 1e-8)
    for i in range(MAP_LAYERS):
        w = w @ params["map_lw"][i] + params["map_lb"][i]
        w = jnp.where(w >= 0, w, LRELU * w) * np.float32(np.sqrt(2.0))

    groups = int(np.ceil(B / VIRTUAL_BS))

    inv2 = lambda h: (0, 0)          # hook-invariant 2-D inputs
    hook3 = lambda h: (h, 0, 0)      # per-hook stacked 3-D inputs

    head_out = pl.pallas_call(
        functools.partial(_head_kernel, groups=groups),
        out_shape=jax.ShapeDtypeStruct((N_HOOKS, 1, BL), jnp.float32),
        grid=(N_HOOKS,),
        in_specs=[
            pl.BlockSpec((BL, PP), inv2),                 # patches
            pl.BlockSpec((1, PP), inv2),                  # preprocessing scale
            pl.BlockSpec((1, PP), inv2),                  # preprocessing shift
            pl.BlockSpec((PP, D), inv2),                  # patch-embed weight (bf16)
            pl.BlockSpec((1, D), inv2),                   # patch-embed bias
            pl.BlockSpec((1, D, D), hook3),               # per-hook feature weight (bf16)
            pl.BlockSpec((1, 1, D), hook3),               # per-hook feature bias
            pl.BlockSpec((B, W_DIM), inv2),               # mapped condition w
            pl.BlockSpec((1, D, D), hook3),               # w1 (k=1, spectral-normed, bf16)
            pl.BlockSpec((1, 1, D), hook3),               # b1
            pl.BlockSpec((1, 1, D), hook3),               # gamma1
            pl.BlockSpec((1, 1, D), hook3),               # beta1
            pl.BlockSpec((1, K9 * D, D), hook3),          # fused w2 (9*D, D) (bf16)
            pl.BlockSpec((1, 1, D), hook3),               # b2
            pl.BlockSpec((1, 1, D), hook3),               # gamma2
            pl.BlockSpec((1, 1, D), hook3),               # beta2
            pl.BlockSpec((1, D, CMAP_DIM), hook3),        # cls weight (bf16)
            pl.BlockSpec((1, 1, CMAP_DIM), hook3),        # cls bias
            pl.BlockSpec((1, W_DIM, CMAP_DIM), hook3),    # cmapper weight (bf16)
            pl.BlockSpec((1, 1, CMAP_DIM), hook3),        # cmapper bias
        ],
        out_specs=pl.BlockSpec((1, 1, BL), hook3),        # lane-dense per-hook logit row
        compiler_params=pltpu.CompilerParams(
            dimension_semantics=("parallel",)),           # hooks independent -> 2 TCs on v7x
    )(patches, params["feat_scale"], params["feat_shift"],
      params["feat_we"], params["feat_be"], params["feat_wh"], params["feat_bh"],
      w,
      params["h_w1"], params["h_b1"], params["h_g1"], params["h_beta1"],
      params["h_w2"], params["h_b2"], params["h_g2"], params["h_beta2"],
      params["h_wc"], params["h_bc"], params["h_wm"], params["h_bm"])

    logits = head_out.reshape(N_HOOKS, B, L)                            # per-head (B, L)
    logits = jnp.transpose(logits, (1, 0, 2)).reshape(B, N_HOOKS * L)   # torch.cat(dim=1)
    return logits


if __name__ == "__main__":
    key = jax.random.PRNGKey(0)
    kx, kc = jax.random.split(key)
    x = jax.random.uniform(kx, (B, 3, IMG, IMG), jnp.float32, minval=-1.0, maxval=1.0)
    c = jax.random.randint(kc, (B, 1), 0, NUM_CLASSES, dtype=jnp.int32)
    params = init_params(0)

    fwd = jax.jit(projected_discriminator_forward)
    logits = jax.block_until_ready(fwd(params, x, c))

    assert logits.shape == (B, N_HOOKS * L), logits.shape
    assert bool(jnp.all(jnp.isfinite(logits)))
    print("KERNEL_OK")
</pallas_src>

<mosaic_0001>
module attributes {stable_mosaic.version = 11 : i64} {
  func.func @_head_kernel(%arg0: i32, %arg1: memref<32x48xf32, #tpu.memory_space<vmem>>, %arg2: memref<1x48xf32, #tpu.memory_space<vmem>>, %arg3: memref<1x48xf32, #tpu.memory_space<vmem>>, %arg4: memref<48x32xbf16, #tpu.memory_space<vmem>>, %arg5: memref<1x32xf32, #tpu.memory_space<vmem>>, %arg6: memref<1x32x32xbf16, #tpu.memory_space<vmem>>, %arg7: memref<1x1x32xf32, #tpu.memory_space<vmem>>, %arg8: memref<2x32xf32, #tpu.memory_space<vmem>>, %arg9: memref<1x32x32xbf16, #tpu.memory_space<vmem>>, %arg10: memref<1x1x32xf32, #tpu.memory_space<vmem>>, %arg11: memref<1x1x32xf32, #tpu.memory_space<vmem>>, %arg12: memref<1x1x32xf32, #tpu.memory_space<vmem>>, %arg13: memref<1x288x32xbf16, #tpu.memory_space<vmem>>, %arg14: memref<1x1x32xf32, #tpu.memory_space<vmem>>, %arg15: memref<1x1x32xf32, #tpu.memory_space<vmem>>, %arg16: memref<1x1x32xf32, #tpu.memory_space<vmem>>, %arg17: memref<1x32x64xbf16, #tpu.memory_space<vmem>>, %arg18: memref<1x1x64xf32, #tpu.memory_space<vmem>>, %arg19: memref<1x32x64xbf16, #tpu.memory_space<vmem>>, %arg20: memref<1x1x64xf32, #tpu.memory_space<vmem>>, %arg21: memref<1x1x32xf32, #tpu.memory_space<vmem>>) attributes {dimension_semantics = [#tpu.dimension_semantics<parallel>], iteration_bounds = array<i64: 5>, scalar_prefetch = 0 : i64, scratch_operands = 0 : i64, tpu.core_type = #tpu.core_type<tc>, window_params = [{pipeline_mode = #tpu.pipeline_mode<synchronous>, transform_indices = @transform_0, window_bounds = array<i64: 32, 48>}, {pipeline_mode = #tpu.pipeline_mode<synchronous>, transform_indices = @transform_1, window_bounds = array<i64: 1, 48>}, {pipeline_mode = #tpu.pipeline_mode<synchronous>, transform_indices = @transform_2, window_bounds = array<i64: 1, 48>}, {pipeline_mode = #tpu.pipeline_mode<synchronous>, transform_indices = @transform_3, window_bounds = array<i64: 48, 32>}, {pipeline_mode = #tpu.pipeline_mode<synchronous>, transform_indices = @transform_4, window_bounds = array<i64: 1, 32>}, {transform_indices = @transform_5, window_bounds = array<i64: 1, 32, 32>}, {transform_indices = @transform_6, window_bounds = array<i64: 1, 1, 32>}, {pipeline_mode = #tpu.pipeline_mode<synchronous>, transform_indices = @transform_7, window_bounds = array<i64: 2, 32>}, {transform_indices = @transform_8, window_bounds = array<i64: 1, 32, 32>}, {transform_indices = @transform_9, window_bounds = array<i64: 1, 1, 32>}, {transform_indices = @transform_10, window_bounds = array<i64: 1, 1, 32>}, {transform_indices = @transform_11, window_bounds = array<i64: 1, 1, 32>}, {transform_indices = @transform_12, window_bounds = array<i64: 1, 288, 32>}, {transform_indices = @transform_13, window_bounds = array<i64: 1, 1, 32>}, {transform_indices = @transform_14, window_bounds = array<i64: 1, 1, 32>}, {transform_indices = @transform_15, window_bounds = array<i64: 1, 1, 32>}, {transform_indices = @transform_16, window_bounds = array<i64: 1, 32, 64>}, {transform_indices = @transform_17, window_bounds = array<i64: 1, 1, 64>}, {transform_indices = @transform_18, window_bounds = array<i64: 1, 32, 64>}, {transform_indices = @transform_19, window_bounds = array<i64: 1, 1, 64>}, {transform_indices = @transform_20, window_bounds = array<i64: 1, 1, 32>}]} {
    %c0 = arith.constant 0 : index
    %c0_0 = arith.constant 0 : index
    %0 = vector.load %arg1[%c0, %c0_0] : memref<32x48xf32, #tpu.memory_space<vmem>>, vector<32x48xf32>
    %c0_1 = arith.constant 0 : index
    %c0_2 = arith.constant 0 : index
    %1 = vector.load %arg2[%c0_1, %c0_2] : memref<1x48xf32, #tpu.memory_space<vmem>>, vector<1x48xf32>
    %2 = vector.broadcast %1 : vector<1x48xf32> to vector<32x48xf32>
    %3 = arith.mulf %0, %2 : vector<32x48xf32>
    %c0_3 = arith.constant 0 : index
    %c0_4 = arith.constant 0 : index
    %4 = vector.load %arg3[%c0_3, %c0_4] : memref<1x48xf32, #tpu.memory_space<vmem>>, vector<1x48xf32>
    %5 = vector.broadcast %4 : vector<1x48xf32> to vector<32x48xf32>
    %6 = arith.addf %3, %5 : vector<32x48xf32>
    %7 = arith.truncf %6 : vector<32x48xf32> to vector<32x48xbf16>
    %c0_5 = arith.constant 0 : index
    %c0_6 = arith.constant 0 : index
    %8 = vector.load %arg4[%c0_5, %c0_6] : memref<48x32xbf16, #tpu.memory_space<vmem>>, vector<48x32xbf16>
    %cst = arith.constant dense<0.000000e+00> : vector<32x32xf32>
    %9 = tpu.matmul %7, %8, %cst {dimension_numbers = #tpu.dot_dimension_numbers<[1], [0], [0], [1], [0, 0, 1, 1], [], []>} : vector<32x48xbf16>, vector<48x32xbf16>, vector<32x32xf32> -> vector<32x32xf32>
    %c0_7 = arith.constant 0 : index
    %c0_8 = arith.constant 0 : index
    %10 = vector.load %arg5[%c0_7, %c0_8] : memref<1x32xf32, #tpu.memory_space<vmem>>, vector<1x32xf32>
    %11 = vector.broadcast %10 : vector<1x32xf32> to vector<32x32xf32>
    %12 = arith.addf %9, %11 : vector<32x32xf32>
    %13 = arith.truncf %12 : vector<32x32xf32> to vector<32x32xbf16>
    %c0_9 = arith.constant 0 : index
    %c0_10 = arith.constant 0 : index
    %c0_11 = arith.constant 0 : index
    %14 = vector.load %arg6[%c0_9, %c0_10, %c0_11] : memref<1x32x32xbf16, #tpu.memory_space<vmem>>, vector<1x32x32xbf16>
    %15 = vector.shape_cast %14 : vector<1x32x32xbf16> to vector<32x32xbf16>
    %cst_12 = arith.constant dense<0.000000e+00> : vector<32x32xf32>
    %16 = tpu.matmul %13, %15, %cst_12 {dimension_numbers = #tpu.dot_dimension_numbers<[1], [0], [0], [1], [0, 0, 1, 1], [], []>} : vector<32x32xbf16>, vector<32x32xbf16>, vector<32x32xf32> -> vector<32x32xf32>
    %c0_13 = arith.constant 0 : index
    %c0_14 = arith.constant 0 : index
    %c0_15 = arith.constant 0 : index
    %17 = vector.load %arg7[%c0_13, %c0_14, %c0_15] : memref<1x1x32xf32, #tpu.memory_space<vmem>>, vector<1x1x32xf32>
    %18 = vector.shape_cast %17 : vector<1x1x32xf32> to vector<1x32xf32>
    %19 = vector.broadcast %18 : vector<1x32xf32> to vector<32x32xf32>
    %20 = arith.addf %16, %19 : vector<32x32xf32>
    %21 = arith.truncf %20 : vector<32x32xf32> to vector<32x32xbf16>
    %c0_16 = arith.constant 0 : index
    %c0_17 = arith.constant 0 : index
    %c0_18 = arith.constant 0 : index
    %22 = vector.load %arg9[%c0_16, %c0_17, %c0_18] : memref<1x32x32xbf16, #tpu.memory_space<vmem>>, vector<1x32x32xbf16>
    %23 = vector.shape_cast %22 : vector<1x32x32xbf16> to vector<32x32xbf16>
    %cst_19 = arith.constant dense<0.000000e+00> : vector<32x32xf32>
    %24 = tpu.matmul %21, %23, %cst_19 {dimension_numbers = #tpu.dot_dimension_numbers<[1], [0], [0], [1], [0, 0, 1, 1], [], []>} : vector<32x32xbf16>, vector<32x32xbf16>, vector<32x32xf32> -> vector<32x32xf32>
    %c0_20 = arith.constant 0 : index
    %c0_21 = arith.constant 0 : index
    %c0_22 = arith.constant 0 : index
    %25 = vector.load %arg10[%c0_20, %c0_21, %c0_22] : memref<1x1x32xf32, #tpu.memory_space<vmem>>, vector<1x1x32xf32>
    %26 = vector.shape_cast %25 : vector<1x1x32xf32> to vector<1x32xf32>
    %27 = vector.broadcast %26 : vector<1x32xf32> to vector<32x32xf32>
    %28 = arith.addf %24, %27 : vector<32x32xf32>
    %c0_23 = arith.constant 0 : index
    %c0_24 = arith.constant 0 : index
    %c0_25 = arith.constant 0 : index
    %29 = vector.load %arg11[%c0_23, %c0_24, %c0_25] : memref<1x1x32xf32, #tpu.memory_space<vmem>>, vector<1x1x32xf32>
    %30 = vector.shape_cast %29 : vector<1x1x32xf32> to vector<1x32xf32>
    %c0_26 = arith.constant 0 : index
    %c0_27 = arith.constant 0 : index
    %c0_28 = arith.constant 0 : index
    %31 = vector.load %arg12[%c0_26, %c0_27, %c0_28] : memref<1x1x32xf32, #tpu.memory_space<vmem>>, vector<1x1x32xf32>
    %32 = vector.shape_cast %31 : vector<1x1x32xf32> to vector<1x32xf32>
    %33 = vector.shape_cast %28 : vector<32x32xf32> to vector<1x32x32xf32>
    %cst_29 = arith.constant dense<0.000000e+00> : vector<1x32xf32>
    %34 = vector.multi_reduction <add>, %33, %cst_29 [1] : vector<1x32x32xf32> to vector<1x32xf32>
    %35 = vector.shape_cast %34 : vector<1x32xf32> to vector<1x1x32xf32>
    %cst_30 = arith.constant 3.200000e+01 : f32
    %36 = vector.broadcast %cst_30 : f32 to vector<1x1x32xf32>
    %37 = arith.divf %35, %36 : vector<1x1x32xf32>
    %38 = vector.broadcast %37 : vector<1x1x32xf32> to vector<1x32x32xf32>
    %39 = arith.subf %33, %38 : vector<1x32x32xf32>
    %40 = arith.mulf %39, %39 : vector<1x32x32xf32>
    %cst_31 = arith.constant dense<0.000000e+00> : vector<1x32xf32>
    %41 = vector.multi_reduction <add>, %40, %cst_31 [1] : vector<1x32x32xf32> to vector<1x32xf32>
    %42 = vector.shape_cast %41 : vector<1x32xf32> to vector<1x1x32xf32>
    %cst_32 = arith.constant 3.200000e+01 : f32
    %43 = vector.broadcast %cst_32 : f32 to vector<1x1x32xf32>
    %44 = arith.divf %42, %43 : vector<1x1x32xf32>
    %45 = vector.broadcast %37 : vector<1x1x32xf32> to vector<1x32x32xf32>
    %46 = arith.subf %33, %45 : vector<1x32x32xf32>
    %cst_33 = arith.constant 9.99999974E-6 : f32
    %47 = vector.broadcast %cst_33 : f32 to vector<1x1x32xf32>
    %48 = arith.addf %44, %47 : vector<1x1x32xf32>
    %49 = math.rsqrt %48 : vector<1x1x32xf32>
    %50 = vector.broadcast %49 : vector<1x1x32xf32> to vector<1x32x32xf32>
    %51 = arith.mulf %46, %50 : vector<1x32x32xf32>
    %52 = vector.shape_cast %30 : vector<1x32xf32> to vector<1x1x32xf32>
    %53 = vector.broadcast %52 : vector<1x1x32xf32> to vector<1x32x32xf32>
    %54 = arith.mulf %51, %53 : vector<1x32x32xf32>
    %55 = vector.shape_cast %32 : vector<1x32xf32> to vector<1x1x32xf32>
    %56 = vector.broadcast %55 : vector<1x1x32xf32> to vector<1x32x32xf32>
    %57 = arith.addf %54, %56 : vector<1x32x32xf32>
    %58 = vector.shape_cast %57 : vector<1x32x32xf32> to vector<32x32xf32>
    %cst_34 = arith.constant 0.000000e+00 : f32
    %59 = vector.broadcast %cst_34 : f32 to vector<32x32xf32>
    %60 = arith.cmpf oge, %58, %59 : vector<32x32xf32>
    %cst_35 = arith.constant 2.000000e-01 : f32
    %61 = vector.broadcast %cst_35 : f32 to vector<32x32xf32>
    %62 = arith.mulf %61, %58 : vector<32x32xf32>
    %63 = arith.select %60, %58, %62 : vector<32x32xi1>, vector<32x32xf32>
    %64 = vector.shape_cast %63 : vector<32x32xf32> to vector<2x16x32xf32>
    %65 = vector.extract_strided_slice %64 {offsets = [0, 12, 0], sizes = [2, 4, 32], strides = [1, 1, 1]} : vector<2x16x32xf32> to vector<2x4x32xf32>
    %66 = vector.extract_strided_slice %64 {offsets = [0, 0, 0], sizes = [2, 12, 32], strides = [1, 1, 1]} : vector<2x16x32xf32> to vector<2x12x32xf32>
    %67 = tpu.concatenate %65, %66 in 1 : vector<2x4x32xf32>, vector<2x12x32xf32> -> vector<2x16x32xf32>
    %68 = vector.extract_strided_slice %64 {offsets = [0, 13, 0], sizes = [2, 3, 32], strides = [1, 1, 1]} : vector<2x16x32xf32> to vector<2x3x32xf32>
    %69 = vector.extract_strided_slice %64 {offsets = [0, 0, 0], sizes = [2, 13, 32], strides = [1, 1, 1]} : vector<2x16x32xf32> to vector<2x13x32xf32>
    %70 = tpu.concatenate %68, %69 in 1 : vector<2x3x32xf32>, vector<2x13x32xf32> -> vector<2x16x32xf32>
    %71 = vector.extract_strided_slice %64 {offsets = [0, 14, 0], sizes = [2, 2, 32], strides = [1, 1, 1]} : vector<2x16x32xf32> to vector<2x2x32xf32>
    %72 = vector.extract_strided_slice %64 {offsets = [0, 0, 0], sizes = [2, 14, 32], strides = [1, 1, 1]} : vector<2x16x32xf32> to vector<2x14x32xf32>
    %73 = tpu.concatenate %71, %72 in 1 : vector<2x2x32xf32>, vector<2x14x32xf32> -> vector<2x16x32xf32>
    %74 = vector.extract_strided_slice %64 {offsets = [0, 15, 0], sizes = [2, 1, 32], strides = [1, 1, 1]} : vector<2x16x32xf32> to vector<2x1x32xf32>
    %75 = vector.extract_strided_slice %64 {offsets = [0, 0, 0], sizes = [2, 15, 32], strides = [1, 1, 1]} : vector<2x16x32xf32> to vector<2x15x32xf32>
    %76 = tpu.concatenate %74, %75 in 1 : vector<2x1x32xf32>, vector<2x15x32xf32> -> vector<2x16x32xf32>
    %77 = vector.extract_strided_slice %64 {offsets = [0, 1, 0], sizes = [2, 15, 32], strides = [1, 1, 1]} : vector<2x16x32xf32> to vector<2x15x32xf32>
    %78 = vector.extract_strided_slice %64 {offsets = [0, 0, 0], sizes = [2, 1, 32], strides = [1, 1, 1]} : vector<2x16x32xf32> to vector<2x1x32xf32>
    %79 = tpu.concatenate %77, %78 in 1 : vector<2x15x32xf32>, vector<2x1x32xf32> -> vector<2x16x32xf32>
    %80 = vector.extract_strided_slice %64 {offsets = [0, 2, 0], sizes = [2, 14, 32], strides = [1, 1, 1]} : vector<2x16x32xf32> to vector<2x14x32xf32>
    %81 = vector.extract_strided_slice %64 {offsets = [0, 0, 0], sizes = [2, 2, 32], strides = [1, 1, 1]} : vector<2x16x32xf32> to vector<2x2x32xf32>
    %82 = tpu.concatenate %80, %81 in 1 : vector<2x14x32xf32>, vector<2x2x32xf32> -> vector<2x16x32xf32>
    %83 = vector.extract_strided_slice %64 {offsets = [0, 3, 0], sizes = [2, 13, 32], strides = [1, 1, 1]} : vector<2x16x32xf32> to vector<2x13x32xf32>
    %84 = vector.extract_strided_slice %64 {offsets = [0, 0, 0], sizes = [2, 3, 32], strides = [1, 1, 1]} : vector<2x16x32xf32> to vector<2x3x32xf32>
    %85 = tpu.concatenate %83, %84 in 1 : vector<2x13x32xf32>, vector<2x3x32xf32> -> vector<2x16x32xf32>
    %86 = vector.extract_strided_slice %64 {offsets = [0, 4, 0], sizes = [2, 12, 32], strides = [1, 1, 1]} : vector<2x16x32xf32> to vector<2x12x32xf32>
    %87 = vector.extract_strided_slice %64 {offsets = [0, 0, 0], sizes = [2, 4, 32], strides = [1, 1, 1]} : vector<2x16x32xf32> to vector<2x4x32xf32>
    %88 = tpu.concatenate %86, %87 in 1 : vector<2x12x32xf32>, vector<2x4x32xf32> -> vector<2x16x32xf32>
    %89 = tpu.concatenate %67, %70, %73, %76, %64, %79, %82, %85, %88 in 2 : vector<2x16x32xf32>, vector<2x16x32xf32>, vector<2x16x32xf32>, vector<2x16x32xf32>, vector<2x16x32xf32>, vector<2x16x32xf32>, vector<2x16x32xf32>, vector<2x16x32xf32>, vector<2x16x32xf32> -> vector<2x16x288xf32>
    %90 = vector.shape_cast %89 : vector<2x16x288xf32> to vector<32x288xf32>
    %91 = arith.truncf %90 : vector<32x288xf32> to vector<32x288xbf16>
    %c0_36 = arith.constant 0 : index
    %c0_37 = arith.constant 0 : index
    %c0_38 = arith.constant 0 : index
    %92 = vector.load %arg13[%c0_36, %c0_37, %c0_38] : memref<1x288x32xbf16, #tpu.memory_space<vmem>>, vector<1x288x32xbf16>
    %93 = vector.shape_cast %92 : vector<1x288x32xbf16> to vector<288x32xbf16>
    %cst_39 = arith.constant dense<0.000000e+00> : vector<32x32xf32>
    %94 = tpu.matmul %91, %93, %cst_39 {dimension_numbers = #tpu.dot_dimension_numbers<[1], [0], [0], [1], [0, 0, 1, 1], [], []>} : vector<32x288xbf16>, vector<288x32xbf16>, vector<32x32xf32> -> vector<32x32xf32>
    %c0_40 = arith.constant 0 : index
    %c0_41 = arith.constant 0 : index
    %c0_42 = arith.constant 0 : index
    %95 = vector.load %arg14[%c0_40, %c0_41, %c0_42] : memref<1x1x32xf32, #tpu.memory_space<vmem>>, vector<1x1x32xf32>
    %96 = vector.shape_cast %95 : vector<1x1x32xf32> to vector<1x32xf32>
    %97 = vector.broadcast %96 : vector<1x32xf32> to vector<32x32xf32>
    %98 = arith.addf %94, %97 : vector<32x32xf32>
    %c0_43 = arith.constant 0 : index
    %c0_44 = arith.constant 0 : index
    %c0_45 = arith.constant 0 : index
    %99 = vector.load %arg15[%c0_43, %c0_44, %c0_45] : memref<1x1x32xf32, #tpu.memory_space<vmem>>, vector<1x1x32xf32>
    %100 = vector.shape_cast %99 : vector<1x1x32xf32> to vector<1x32xf32>
    %c0_46 = arith.constant 0 : index
    %c0_47 = arith.constant 0 : index
    %c0_48 = arith.constant 0 : index
    %101 = vector.load %arg16[%c0_46, %c0_47, %c0_48] : memref<1x1x32xf32, #tpu.memory_space<vmem>>, vector<1x1x32xf32>
    %102 = vector.shape_cast %101 : vector<1x1x32xf32> to vector<1x32xf32>
    %103 = vector.shape_cast %98 : vector<32x32xf32> to vector<1x32x32xf32>
    %cst_49 = arith.constant dense<0.000000e+00> : vector<1x32xf32>
    %104 = vector.multi_reduction <add>, %103, %cst_49 [1] : vector<1x32x32xf32> to vector<1x32xf32>
    %105 = vector.shape_cast %104 : vector<1x32xf32> to vector<1x1x32xf32>
    %cst_50 = arith.constant 3.200000e+01 : f32
    %106 = vector.broadcast %cst_50 : f32 to vector<1x1x32xf32>
    %107 = arith.divf %105, %106 : vector<1x1x32xf32>
    %108 = vector.broadcast %107 : vector<1x1x32xf32> to vector<1x32x32xf32>
    %109 = arith.subf %103, %108 : vector<1x32x32xf32>
    %110 = arith.mulf %109, %109 : vector<1x32x32xf32>
    %cst_51 = arith.constant dense<0.000000e+00> : vector<1x32xf32>
    %111 = vector.multi_reduction <add>, %110, %cst_51 [1] : vector<1x32x32xf32> to vector<1x32xf32>
    %112 = vector.shape_cast %111 : vector<1x32xf32> to vector<1x1x32xf32>
    %cst_52 = arith.constant 3.200000e+01 : f32
    %113 = vector.broadcast %cst_52 : f32 to vector<1x1x32xf32>
    %114 = arith.divf %112, %113 : vector<1x1x32xf32>
    %115 = vector.broadcast %107 : vector<1x1x32xf32> to vector<1x32x32xf32>
    %116 = arith.subf %103, %115 : vector<1x32x32xf32>
    %cst_53 = arith.constant 9.99999974E-6 : f32
    %117 = vector.broadcast %cst_53 : f32 to vector<1x1x32xf32>
    %118 = arith.addf %114, %117 : vector<1x1x32xf32>
    %119 = math.rsqrt %118 : vector<1x1x32xf32>
    %120 = vector.broadcast %119 : vector<1x1x32xf32> to vector<1x32x32xf32>
    %121 = arith.mulf %116, %120 : vector<1x32x32xf32>
    %122 = vector.shape_cast %100 : vector<1x32xf32> to vector<1x1x32xf32>
    %123 = vector.broadcast %122 : vector<1x1x32xf32> to vector<1x32x32xf32>
    %124 = arith.mulf %121, %123 : vector<1x32x32xf32>
    %125 = vector.shape_cast %102 : vector<1x32xf32> to vector<1x1x32xf32>
    %126 = vector.broadcast %125 : vector<1x1x32xf32> to vector<1x32x32xf32>
    %127 = arith.addf %124, %126 : vector<1x32x32xf32>
    %128 = vector.shape_cast %127 : vector<1x32x32xf32> to vector<32x32xf32>
    %cst_54 = arith.constant 0.000000e+00 : f32
    %129 = vector.broadcast %cst_54 : f32 to vector<32x32xf32>
    %130 = arith.cmpf oge, %128, %129 : vector<32x32xf32>
    %cst_55 = arith.constant 2.000000e-01 : f32
    %131 = vector.broadcast %cst_55 : f32 to vector<32x32xf32>
    %132 = arith.mulf %131, %128 : vector<32x32xf32>
    %133 = arith.select %130, %128, %132 : vector<32x32xi1>, vector<32x32xf32>
    %134 = arith.addf %133, %63 : vector<32x32xf32>
    %cst_56 = arith.constant 0.707106769 : f32
    %135 = vector.broadcast %cst_56 : f32 to vector<32x32xf32>
    %136 = arith.mulf %134, %135 : vector<32x32xf32>
    %137 = arith.truncf %136 : vector<32x32xf32> to vector<32x32xbf16>
    %c0_57 = arith.constant 0 : index
    %c0_58 = arith.constant 0 : index
    %c0_59 = arith.constant 0 : index
    %138 = vector.load %arg17[%c0_57, %c0_58, %c0_59] : memref<1x32x64xbf16, #tpu.memory_space<vmem>>, vector<1x32x64xbf16>
    %139 = vector.shape_cast %138 : vector<1x32x64xbf16> to vector<32x64xbf16>
    %cst_60 = arith.constant dense<0.000000e+00> : vector<32x64xf32>
    %140 = tpu.matmul %137, %139, %cst_60 {dimension_numbers = #tpu.dot_dimension_numbers<[1], [0], [0], [1], [0, 0, 1, 1], [], []>} : vector<32x32xbf16>, vector<32x64xbf16>, vector<32x64xf32> -> vector<32x64xf32>
    %c0_61 = arith.constant 0 : index
    %c0_62 = arith.constant 0 : index
    %c0_63 = arith.constant 0 : index
    %141 = vector.load %arg18[%c0_61, %c0_62, %c0_63] : memref<1x1x64xf32, #tpu.memory_space<vmem>>, vector<1x1x64xf32>
    %142 = vector.shape_cast %141 : vector<1x1x64xf32> to vector<1x64xf32>
    %143 = vector.broadcast %142 : vector<1x64xf32> to vector<32x64xf32>
    %144 = arith.addf %140, %143 : vector<32x64xf32>
    %c0_64 = arith.constant 0 : index
    %c0_65 = arith.constant 0 : index
    %145 = vector.load %arg8[%c0_64, %c0_65] : memref<2x32xf32, #tpu.memory_space<vmem>>, vector<2x32xf32>
    %146 = arith.truncf %145 : vector<2x32xf32> to vector<2x32xbf16>
    %c0_66 = arith.constant 0 : index
    %c0_67 = arith.constant 0 : index
    %c0_68 = arith.constant 0 : index
    %147 = vector.load %arg19[%c0_66, %c0_67, %c0_68] : memref<1x32x64xbf16, #tpu.memory_space<vmem>>, vector<1x32x64xbf16>
    %148 = vector.shape_cast %147 : vector<1x32x64xbf16> to vector<32x64xbf16>
    %cst_69 = arith.constant dense<0.000000e+00> : vector<2x64xf32>
    %149 = tpu.matmul %146, %148, %cst_69 {dimension_numbers = #tpu.dot_dimension_numbers<[1], [0], [0], [1], [0, 0, 1, 1], [], []>} : vector<2x32xbf16>, vector<32x64xbf16>, vector<2x64xf32> -> vector<2x64xf32>
    %c0_70 = arith.constant 0 : index
    %c0_71 = arith.constant 0 : index
    %c0_72 = arith.constant 0 : index
    %150 = vector.load %arg20[%c0_70, %c0_71, %c0_72] : memref<1x1x64xf32, #tpu.memory_space<vmem>>, vector<1x1x64xf32>
    %151 = vector.shape_cast %150 : vector<1x1x64xf32> to vector<1x64xf32>
    %152 = vector.broadcast %151 : vector<1x64xf32> to vector<2x64xf32>
    %153 = arith.addf %149, %152 : vector<2x64xf32>
    %154 = vector.shape_cast %153 : vector<2x64xf32> to vector<2x1x64xf32>
    %155 = vector.shape_cast %154 : vector<2x1x64xf32> to vector<2x1x64xf32>
    %156 = vector.broadcast %155 : vector<2x1x64xf32> to vector<2x16x64xf32>
    %157 = vector.shape_cast %156 : vector<2x16x64xf32> to vector<32x64xf32>
    %158 = arith.mulf %144, %157 : vector<32x64xf32>
    %cst_73 = arith.constant dense<0.000000e+00> : vector<32xf32>
    %159 = vector.multi_reduction <add>, %158, %cst_73 [1] : vector<32x64xf32> to vector<32xf32>
    %cst_74 = arith.constant 1.250000e-01 : f32
    %160 = vector.broadcast %cst_74 : f32 to vector<32xf32>
    %161 = arith.mulf %159, %160 : vector<32xf32>
    %162 = vector.shape_cast %161 : vector<32xf32> to vector<1x1x32xf32>
    %c0_75 = arith.constant 0 : index
    %c0_76 = arith.constant 0 : index
    %c0_77 = arith.constant 0 : index
    %163 = vector.load %arg21[%c0_75, %c0_76, %c0_77] : memref<1x1x32xf32, #tpu.memory_space<vmem>>, vector<1x1x32xf32>
    tpu.vector_store %arg21[%c0_75, %c0_76, %c0_77], %162 {strides = array<i32>} : memref<1x1x32xf32, #tpu.memory_space<vmem>>, vector<1x1x32xf32>,
    return
  }
  func.func @transform_0(%arg0: i32) -> (i32, i32) {
    %c0_i32 = arith.constant 0 : i32
    %c0_i32_0 = arith.constant 0 : i32
    %c0_i32_1 = arith.constant 0 : i32
    return %c0_i32, %c0_i32_0 : i32, i32
  }
  func.func @transform_1(%arg0: i32) -> (i32, i32) {
    %c0_i32 = arith.constant 0 : i32
    %c0_i32_0 = arith.constant 0 : i32
    %c0_i32_1 = arith.constant 0 : i32
    return %c0_i32, %c0_i32_0 : i32, i32
  }
  func.func @transform_2(%arg0: i32) -> (i32, i32) {
    %c0_i32 = arith.constant 0 : i32
    %c0_i32_0 = arith.constant 0 : i32
    %c0_i32_1 = arith.constant 0 : i32
    return %c0_i32, %c0_i32_0 : i32, i32
  }
  func.func @transform_3(%arg0: i32) -> (i32, i32) {
    %c0_i32 = arith.constant 0 : i32
    %c0_i32_0 = arith.constant 0 : i32
    %c0_i32_1 = arith.constant 0 : i32
    return %c0_i32, %c0_i32_0 : i32, i32
  }
  func.func @transform_4(%arg0: i32) -> (i32, i32) {
    %c0_i32 = arith.constant 0 : i32
    %c0_i32_0 = arith.constant 0 : i32
    %c0_i32_1 = arith.constant 0 : i32
    return %c0_i32, %c0_i32_0 : i32, i32
  }
  func.func @transform_5(%arg0: i32) -> (i32, i32, i32) {
    %c0_i32 = arith.constant 0 : i32
    %c0_i32_0 = arith.constant 0 : i32
    %c0_i32_1 = arith.constant 0 : i32
    return %arg0, %c0_i32, %c0_i32_0 : i32, i32, i32
  }
  func.func @transform_6(%arg0: i32) -> (i32, i32, i32) {
    %c0_i32 = arith.constant 0 : i32
    %c0_i32_0 = arith.constant 0 : i32
    %c0_i32_1 = arith.constant 0 : i32
    return %arg0, %c0_i32, %c0_i32_0 : i32, i32, i32
  }
  func.func @transform_7(%arg0: i32) -> (i32, i32) {
    %c0_i32 = arith.constant 0 : i32
    %c0_i32_0 = arith.constant 0 : i32
    %c0_i32_1 = arith.constant 0 : i32
    return %c0_i32, %c0_i32_0 : i32, i32
  }
  func.func @transform_8(%arg0: i32) -> (i32, i32, i32) {
    %c0_i32 = arith.constant 0 : i32
    %c0_i32_0 = arith.constant 0 : i32
    %c0_i32_1 = arith.constant 0 : i32
    return %arg0, %c0_i32, %c0_i32_0 : i32, i32, i32
  }
  func.func @transform_9(%arg0: i32) -> (i32, i32, i32) {
    %c0_i32 = arith.constant 0 : i32
    %c0_i32_0 = arith.constant 0 : i32
    %c0_i32_1 = arith.constant 0 : i32
    return %arg0, %c0_i32, %c0_i32_0 : i32, i32, i32
  }
  func.func @transform_10(%arg0: i32) -> (i32, i32, i32) {
    %c0_i32 = arith.constant 0 : i32
    %c0_i32_0 = arith.constant 0 : i32
    %c0_i32_1 = arith.constant 0 : i32
    return %arg0, %c0_i32, %c0_i32_0 : i32, i32, i32
  }
  func.func @transform_11(%arg0: i32) -> (i32, i32, i32) {
    %c0_i32 = arith.constant 0 : i32
    %c0_i32_0 = arith.constant 0 : i32
    %c0_i32_1 = arith.constant 0 : i32
    return %arg0, %c0_i32, %c0_i32_0 : i32, i32, i32
  }
  func.func @transform_12(%arg0: i32) -> (i32, i32, i32) {
    %c0_i32 = arith.constant 0 : i32
    %c0_i32_0 = arith.constant 0 : i32
    %c0_i32_1 = arith.constant 0 : i32
    return %arg0, %c0_i32, %c0_i32_0 : i32, i32, i32
  }
  func.func @transform_13(%arg0: i32) -> (i32, i32, i32) {
    %c0_i32 = arith.constant 0 : i32
    %c0_i32_0 = arith.constant 0 : i32
    %c0_i32_1 = arith.constant 0 : i32
    return %arg0, %c0_i32, %c0_i32_0 : i32, i32, i32
  }
  func.func @transform_14(%arg0: i32) -> (i32, i32, i32) {
    %c0_i32 = arith.constant 0 : i32
    %c0_i32_0 = arith.constant 0 : i32
    %c0_i32_1 = arith.constant 0 : i32
    return %arg0, %c0_i32, %c0_i32_0 : i32, i32, i32
  }
  func.func @transform_15(%arg0: i32) -> (i32, i32, i32) {
    %c0_i32 = arith.constant 0 : i32
    %c0_i32_0 = arith.constant 0 : i32
    %c0_i32_1 = arith.constant 0 : i32
    return %arg0, %c0_i32, %c0_i32_0 : i32, i32, i32
  }
  func.func @transform_16(%arg0: i32) -> (i32, i32, i32) {
    %c0_i32 = arith.constant 0 : i32
    %c0_i32_0 = arith.constant 0 : i32
    %c0_i32_1 = arith.constant 0 : i32
    return %arg0, %c0_i32, %c0_i32_0 : i32, i32, i32
  }
  func.func @transform_17(%arg0: i32) -> (i32, i32, i32) {
    %c0_i32 = arith.constant 0 : i32
    %c0_i32_0 = arith.constant 0 : i32
    %c0_i32_1 = arith.constant 0 : i32
    return %arg0, %c0_i32, %c0_i32_0 : i32, i32, i32
  }
  func.func @transform_18(%arg0: i32) -> (i32, i32, i32) {
    %c0_i32 = arith.constant 0 : i32
    %c0_i32_0 = arith.constant 0 : i32
    %c0_i32_1 = arith.constant 0 : i32
    return %arg0, %c0_i32, %c0_i32_0 : i32, i32, i32
  }
  func.func @transform_19(%arg0: i32) -> (i32, i32, i32) {
    %c0_i32 = arith.constant 0 : i32
    %c0_i32_0 = arith.constant 0 : i32
    %c0_i32_1 = arith.constant 0 : i32
    return %arg0, %c0_i32, %c0_i32_0 : i32, i32, i32
  }
  func.func @transform_20(%arg0: i32) -> (i32, i32, i32) {
    %c0_i32 = arith.constant 0 : i32
    %c0_i32_0 = arith.constant 0 : i32
    %c0_i32_1 = arith.constant 0 : i32
    return %arg0, %c0_i32, %c0_i32_0 : i32, i32, i32
  }
}

</mosaic_0001>

<bundles_post_ra>
// kernel: projected_discriminator_forward.1
= control target key start
LH: loop header
LB: loop body
LE: loop exit
PB: predicated region body
PF: predicated region fallthrough
CT: control target
= control target key end

     0   :  { %s2622_s0 = inlined_call_operand.vmem [shape: f32[32,48], index: 0, kind: input, shape index: {}]   ;;  %s2623_s1 = inlined_call_operand.vmem [shape: f32[1,48], index: 1, kind: input, shape index: {}]   ;;  %s2624_s2 = inlined_call_operand.vmem [shape: f32[1,48], index: 2, kind: input, shape index: {}]   ;;  %s2625_s3 = inlined_call_operand.vmem [shape: bf16[48,32], index: 3, kind: input, shape index: {}]   ;;  %s2626_s4 = inlined_call_operand.vmem [shape: f32[1,32], index: 4, kind: input, shape index: {}]   ;;  %s2627_s5 = inlined_call_operand.vmem [shape: bf16[5,32,32], index: 5, kind: input, shape index: {}]   ;;  %s2628_s6 = inlined_call_operand.vmem [shape: f32[5,1,32], index: 6, kind: input, shape index: {}]   ;;  %s2629_s7 = inlined_call_operand.vmem [shape: f32[2,32], index: 7, kind: input, shape index: {}]   ;;  %s2630_s8 = inlined_call_operand.vmem [shape: bf16[5,32,32], index: 8, kind: input, shape index: {}]   ;;  %s2631_s9 = inlined_call_operand.vmem [shape: f32[5,1,32], index: 9, kind: input, shape index: {}]   ;;  %s2632_s10 = inlined_call_operand.vmem [shape: f32[5,1,32], index: 10, kind: input, shape index: {}]   ;;  %s2633_s11 = inlined_call_operand.vmem [shape: f32[5,1,32], index: 11, kind: input, shape index: {}]   ;;  %s2634_s12 = inlined_call_operand.vmem [shape: bf16[5,288,32], index: 12, kind: input, shape index: {}]   ;;  %s2635_s13 = inlined_call_operand.vmem [shape: f32[5,1,32], index: 13, kind: input, shape index: {}]   ;;  %s2636_s14 = inlined_call_operand.vmem [shape: f32[5,1,32], index: 14, kind: input, shape index: {}]   ;;  %s2637_s15 = inlined_call_operand.vmem [shape: f32[5,1,32], index: 15, kind: input, shape index: {}]   ;;  %s2638_s16 = inlined_call_operand.vmem [shape: bf16[5,32,64], index: 16, kind: input, shape index: {}]   ;;  %s2639_s17 = inlined_call_operand.vmem [shape: f32[5,1,64], index: 17, kind: input, shape index: {}]   ;;  %s2640_s18 = inlined_call_operand.vmem [shape: bf16[5,32,64], index: 18, kind: input, shape index: {}]   ;;  %s2641_s19 = inlined_call_operand.vmem [shape: f32[5,1,64], index: 19, kind: input, shape index: {}]   ;;  %s2642_s20 = inlined_call_operand.vmem [shape: f32[5,1,32], index: 20, kind: output, shape index: {}]  }
   0x1   :  { %2646 = sst [smem:[#allocation2_spill]] %s2622_s0 }
   0x2   :  { %2647 = sst [smem:[#allocation3_spill]] %s2623_s1  ;;  %s2294_s1 = smov 0  }
   0x3   :  { %2648 = sst [smem:[#allocation4_spill]] %s2624_s2 }
   0x4   :  { %2649 = sst [smem:[#allocation5_spill]] %s2625_s3 }
   0x5   :  { %2650 = sst [smem:[#allocation6_spill]] %s2626_s4 }
   0x6   :  { %2651 = sst [smem:[#allocation7_spill]] %s2627_s5 }
   0x7 LB: > { %p1914_p0 = scmp.ge.s32.totalorder %s2183_s1, 1  ;;  %p674_p1 = scmp.lt.s32.totalorder %s2183_s1, 6  ;;  %s2183_s1 = sphi %s2294_s1, %s30_s1  }
   0x9   : > { %p675_p2 = pnand %p1914_p0, %p674_p1 }
   0xa   : > { %s2652_s2 = sld [smem:[#allocation5_spill]] (!%p675_p2)  ;;  %s2656_s29 = sadd.s32 (!%p675_p2), 4294967295, %s2183_s1  }
   0xb   : > { %678 = sbr.rel (%p675_p2) target bundleno = 1184 (0x4a0), region = 100  ;;  %s2653_s28 = sld [smem:[#allocation2_spill]] (!%p675_p2) }
   0xc   : > { %s2654_s21 = sld [smem:[#allocation3_spill]] (!%p675_p2)  ;;  %p777_p3 = scmp.lt.s32.totalorder (!%p675_p2), %s2656_s29, 4 }
   0xd   : > { %s2655_s24 = sld [smem:[#allocation4_spill]] (!%p675_p2)  ;;  %s2657_s30 = smov (!%p675_p2), %s2656_s29 }
   0xe   : > { %s2658_s5 = sld [smem:[#allocation7_spill]] (!%p675_p2) }
   0xf   : > { %s2659_s4 = sld [smem:[#allocation6_spill]] (!%p675_p2) }
  0x10   : > { %v2059_v0 = vld [vmem:[%s2652_s2 + $0x10] sm:$0xff]  ;;  %v2058_v1 = vld [vmem:[%s2652_s2 + $0x8] sm:$0xff]  ;;  %v2057_v8 = vld [vmem:[%s2652_s2] sm:$0xff]  ;;  %vm883_vm0 = vcmask 392192   ;;  %s2662_s30 = smov (!%p777_p3, %s2657_s30), 4  ;;  %vm931_vm1 = vcmask 261120  }
  0x11   : > { %v833_v2 = vld [vmem:[%s2653_s28] sm:$0xff]  ;;  %v834_v3 = vld [vmem:[%s2653_s28 + $0x8] sm:$0xff]  ;;  %895 = vmatpush.bf16.msra.mxu0 %v2059_v0  ;;  %v835_v12 = vld [vmem:[%s2653_s28 + $0x10] sm:$0xff]  ;;  %s784_s23 = scalar_lea.vmem %s2628_s6, %s2662_s30  ;;  %v2185_v47 = vmov 32.0   ;;  %vm1161_vm8 = vcmask 1045504   ;;  %vm1139_vm9 = vcmask 1040384   ;;  %s809_s29 = scalar_lea.vmem %s2636_s14, %s2662_s30 }
  0x12   : > { %v2159_v4 = vld [vmem:[%s2654_s21] ss:$0 sm:$0xff]  ;;  %v836_v13 = vld [vmem:[%s2653_s28 + $0x18] sm:$0xff]  ;;  %s792_s21 = scalar_lea.vmem %s2631_s9, %s2662_s30  ;;  %2171 = vrcp.f32 %v2185_v47  ;;  %vm1113_vm10 = vcmask 1042432   ;;  %vm1098_vm11 = vcmask 1043456   ;;  %vm1174_vm12 = vcmask 1044480   ;;  %s828_s3 = scalar_lea.vmem %s2641_s19, %s2662_s30 }
  0x13   : > { %v2160_v5 = vld [vmem:[%s2655_s24] ss:$0 sm:$0xff]  ;;  %v841_v6 = vmul.f32 %v2159_v4, %v833_v2  ;;  %v842_v7 = vmul.f32 %v2159_v4, %v834_v3  ;;  %v843_v14 = vmul.f32 %v2159_v4, %v835_v12  ;;  %v844_v15 = vmul.f32 %v2159_v4, %v836_v13  ;;  %s2340_s24 = sshll.u32 %s2662_s30, 4 }
  0x14   : > { %s781_s26 = scalar_lea.vmem %s2658_s5, %s2340_s24  ;;  %v2162_v35 = vld [vmem:[%s784_s23] ss:$0 sm:$0xff]  ;;  %s798_s23 = scalar_lea.vmem %s2633_s11, %s2662_s30  ;;  %vm1148_vm13 = vcmask 1046528  }
  0x15   : > { %896 = vmatpush.bf16.msra.mxu0 %v2058_v1  ;;  %v849_v9 = vadd.f32 %v2160_v5, %v841_v6  ;;  %v850_v10 = vadd.f32 %v2160_v5, %v842_v7  ;;  %v851_v16 = vadd.f32 %v2160_v5, %v843_v14  ;;  %v852_v17 = vadd.f32 %v2160_v5, %v844_v15  ;;  %v2061_v19 = vld [vmem:[%s781_s26 + $0x8] sm:$0xff]  ;;  %v2060_v20 = vld [vmem:[%s781_s26] sm:$0xff]  ;;  %s789_s26 = scalar_lea.vmem %s2630_s8, %s2340_s24  ;;  %s2660_s5 = scalar_lea.vmem %s2635_s13, %s2662_s30 }
  0x16   : > { %944 = vmatpush.bf16.msra.mxu1 %v2061_v19  ;;  %v2161_v22 = vld [vmem:[%s2659_s4] ss:$0 sm:$0xff]  ;;  %v2063_v32 = vld [vmem:[%s789_s26 + $0x8] sm:$0xff]  ;;  %s795_s4 = scalar_lea.vmem %s2632_s10, %s2662_s30  ;;  %s825_s0 = scalar_lea.vmem %s2640_s18, %s2340_s24 }
  0x17   : > { %v853_v11 = vpack.c.bf16 %v850_v10, %v849_v9  ;;  %v854_v18 = vpack.c.bf16 %v852_v17, %v851_v16  ;;  %991 = vmatpush.bf16.msra.mxu2 %v2063_v32  ;;  %v2062_v33 = vld [vmem:[%s789_s26] sm:$0xff] }
  0x18   : > { %v2163_v48 = vld [vmem:[%s792_s21] ss:$0 sm:$0xff]  ;;  %v2172_v53 = vpop.eup %2171  ;;  %s2086_s21 = smul.u32 144, %s2662_s30 }
  0x19   : > { %897 = vmatpush.bf16.msra.mxu0 %v2057_v8  ;;  %v1020_v57 = vmul.f32 32.0, %v2172_v53  ;;  %vm1024_vm2 = vweird.f32 %v2172_v53 }
  0x1a   : > { %945 = vmatpush.bf16.msra.mxu1 %v2060_v20  ;;  %s2384_s26 = scalar_lea.vmem %s2634_s12, %s2086_s21  ;;  %s2188_s21 = smov 32  }
  0x1b   : > { %992 = vmatpush.bf16.msra.mxu2 %v2062_v33  ;;  %v1021_v63 = vsub.f32 1.0, %v1020_v57 }
  0x1c   : > { %1936 = vmatmul.msk.bf16.vlgmr.msra.gmra.mxu0 %vm883_vm0, %v853_v11 }
  0x1d   : > { %v1022_v2 = vmul.f32 %v2172_v53, %v1021_v63 }
  0x1f   : > { %v1023_v5 = vadd.f32 %v2172_v53, %v1022_v2 }
  0x21   : > { %v2373_v8 = vsel %vm1024_vm2, %v2172_v53, %v1023_v5  ;;  %vm1275_vm2 = vcmask 523264  }
  0x2c   : > { %1937 = vmatmul.msk.bf16.gmra.mxu0 %vm883_vm0, %v854_v18  ;;  %vm1126_vm0 = vcmask 1041408  }
  0x99   : > { %v899_v21 = vpop.f32.mrf.mxu0 }
  0x9a   : > { %v900_v24 = vadd.f32 %v2161_v22, %v899_v21 }
  0xa1   : > { %v901_v23 = vpop.f32.mrf.mxu0 }
  0xa2   : > { %v902_v25 = vadd.f32 %v2161_v22, %v901_v23 }
  0xa4   : > { %v909_v26 = vpack.c.bf16 %v902_v25, %v900_v24 }
  0xa6   : > { %1946 = vmatmul.msk.bf16.vlgmr.msra.gmra.mxu1 %vm931_vm1, %v909_v26 }
  0xa9   : > { %v904_v27 = vpop.f32.mrf.mxu0 }
  0xaa   : > { %v905_v29 = vadd.f32 %v2161_v22, %v904_v27 }
  0xb1   : > { %v906_v28 = vpop.f32.mrf.mxu0 }
  0xb2   : > { %v907_v30 = vadd.f32 %v2161_v22, %v906_v28 }
  0xb4   : > { %v910_v31 = vpack.c.bf16 %v907_v30, %v905_v29 }
  0xb6   : > { %1947 = vmatmul.msk.bf16.gmra.mxu1 %vm931_vm1, %v910_v31  ;;  %v2081_v31 = vld [vmem:[%s2384_s26 + $0x88] sm:$0xff] }
  0xb7   : > { %1501 = vmatpush.bf16.msrb.mxu2 %v2081_v31 }
 0x123   : > { %v947_v34 = vpop.f32.mrf.mxu1 }
 0x124   : > { %v948_v37 = vadd.f32 %v2162_v35, %v947_v34  ;;  %v2080_v34 = vld [vmem:[%s2384_s26 + $0x80] sm:$0xff] }
 0x125   : > { %1502 = vmatpush.bf16.msrb.mxu2 %v2080_v34 }
 0x12b   : > { %v949_v36 = vpop.f32.mrf.mxu1 }
 0x12c   : > { %v950_v38 = vadd.f32 %v2162_v35, %v949_v36 }
 0x12e   : > { %v957_v39 = vpack.c.bf16 %v950_v38, %v948_v37 }
 0x130   : > { %1956 = vmatmul.msk.bf16.vlgmr.msra.gmra.mxu2 %vm931_vm1, %v957_v39 }
 0x133   : > { %v952_v40 = vpop.f32.mrf.mxu1 }
 0x134   : > { %v953_v42 = vadd.f32 %v2162_v35, %v952_v40 }
 0x13b   : > { %v954_v41 = vpop.f32.mrf.mxu1 }
 0x13c   : > { %v955_v43 = vadd.f32 %v2162_v35, %v954_v41 }
 0x13e   : > { %v958_v44 = vpack.c.bf16 %v955_v43, %v953_v42  ;;  %v2164_v42 = vld [vmem:[%s795_s4] ss:$0 sm:$0xff]  ;;  %s2186_s4 = smov 64  }
 0x140   : > { %1957 = vmatmul.msk.bf16.gmra.mxu2 %vm931_vm1, %v958_v44 }
 0x1b3   : > { %v994_v45 = vpop.f32.mrf.mxu2 }
 0x1b4   : > { %v995_v51 = vadd.f32 %v2163_v48, %v994_v45 }
 0x1b6   : > { %v1006_v55 = vsel %vm931_vm1, %v995_v51, 0.0 }
 0x1bb   : > { %v996_v46 = vpop.f32.mrf.mxu2 }
 0x1bc   : > { %v997_v50 = vadd.f32 %v2163_v48, %v996_v46 }
 0x1be   : > { %v1007_v54 = vsel %vm931_vm1, %v997_v50, 0.0 }
 0x1bf   : > { %v1008_v58 = vadd.f32 %v1007_v54, %v1006_v55 }
 0x1c3   : > { %v999_v49 = vpop.f32.mrf.mxu2 }
 0x1c4   : > { %v1000_v52 = vadd.f32 %v2163_v48, %v999_v49 }
 0x1c6   : > { %v1009_v56 = vsel %vm931_vm1, %v1000_v52, 0.0 }
 0x1c7   : > { %v1010_v61 = vadd.f32 %v1009_v56, %v1008_v58 }
 0x1cb   : > { %v1001_v59 = vpop.f32.mrf.mxu2 }
 0x1cc   : > { %v1002_v60 = vadd.f32 %v2163_v48, %v1001_v59  ;;  %v2165_v48 = vld [vmem:[%s798_s23] ss:$0 sm:$0xff]  ;;  %s2187_s23 = smov 96  }
 0x1ce   : > { %v1011_v62 = vsel %vm931_vm1, %v1002_v60, 0.0 }
 0x1cf   : > { %v1012_v0 = vadd.f32 %v1011_v62, %v1010_v61 }
 0x1d1   : > { %v1013_v1 = vrot.slane %v1012_v0, 4 }
 0x1d3   : > { %v1014_v3 = vadd.f32 %v1013_v1, %v1012_v0 }
 0x1d5   : > { %v1015_v4 = vrot.slane %v1014_v3, 2 }
 0x1d7   : > { %v1016_v6 = vadd.f32 %v1015_v4, %v1014_v3 }
 0x1d9   : > { %v1017_v7 = vrot.slane %v1016_v6, 1 }
 0x1db   : > { %v1018_v9 = vadd.f32 %v1017_v7, %v1016_v6 }
 0x1dd   : > { %v1026_v10 = vmul.f32 %v2373_v8, %v1018_v9 }
 0x1df   : > { %v1027_v11 = vsub.f32 %v995_v51, %v1026_v10  ;;  %v1028_v12 = vsub.f32 %v997_v50, %v1026_v10  ;;  %v1029_v13 = vsub.f32 %v1000_v52, %v1026_v10  ;;  %v1030_v14 = vsub.f32 %v1002_v60, %v1026_v10 }
 0x1e1   : > { %v1031_v15 = vmul.f32 %v1027_v11, %v1027_v11  ;;  %v1032_v16 = vmul.f32 %v1028_v12, %v1028_v12  ;;  %v1033_v17 = vmul.f32 %v1029_v13, %v1029_v13  ;;  %v1034_v18 = vmul.f32 %v1030_v14, %v1030_v14 }
 0x1e3   : > { %v1035_v19 = vsel %vm931_vm1, %v1031_v15, 0.0  ;;  %v1036_v20 = vsel %vm931_vm1, %v1032_v16, 0.0  ;;  %v1038_v22 = vsel %vm931_vm1, %v1033_v17, 0.0  ;;  %v1040_v24 = vsel %vm931_vm1, %v1034_v18, 0.0 }
 0x1e4   : > { %v1037_v21 = vadd.f32 %v1036_v20, %v1035_v19 }
 0x1e6   : > { %v1039_v23 = vadd.f32 %v1038_v22, %v1037_v21 }
 0x1e8   : > { %v1041_v25 = vadd.f32 %v1040_v24, %v1039_v23 }
 0x1ea   : > { %v1042_v26 = vrot.slane %v1041_v25, 4 }
 0x1ec   : > { %v1043_v27 = vadd.f32 %v1042_v26, %v1041_v25 }
 0x1ee   : > { %v1044_v28 = vrot.slane %v1043_v27, 2 }
 0x1f0   : > { %v1045_v29 = vadd.f32 %v1044_v28, %v1043_v27 }
 0x1f2   : > { %v1046_v30 = vrot.slane %v1045_v29, 1 }
 0x1f4   : > { %v1047_v32 = vadd.f32 %v1046_v30, %v1045_v29 }
 0x1f6   : > { %v1048_v33 = vmul.f32 %v1047_v32, %v2373_v8 }
 0x1f8   : > { %v1049_v35 = vadd.f32 1e-05, %v1048_v33 }
 0x1fa   : > { %2173 = vrsqrt.f32 %v1049_v35  ;;  %vm1056_vm4 = vweird.f32 %v1049_v35 }
 0x200   : > { %v2174_v36 = vpop.eup %2173 }
 0x201   : > { %v1051_v37 = vmul.f32 %v2174_v36, %v1049_v35  ;;  %vm1057_vm3 = vweird.f32 %v2174_v36 }
 0x202   : > { %vm1058_vm5 = vmor %vm1056_vm4, %vm1057_vm3  ;;  %vm1280_vm3 = vcmask 785408  }
 0x203   : > { %v1052_v38 = vmul.f32 %v2174_v36, %v1051_v37 }
 0x205   : > { %v1053_v39 = vmul.f32 0.5, %v1052_v38 }
 0x207   : > { %v1054_v40 = vsub.f32 1.5, %v1053_v39 }
 0x209   : > { %v1055_v41 = vmul.f32 %v2174_v36, %v1054_v40 }
 0x20b   : > { %v1059_v43 = vsel %vm1058_vm5, %v2174_v36, %v1055_v41 }
 0x20c   : > { %v1060_v44 = vmul.f32 %v1059_v43, %v1027_v11  ;;  %v1061_v45 = vmul.f32 %v1059_v43, %v1028_v12  ;;  %v1062_v46 = vmul.f32 %v1059_v43, %v1029_v13  ;;  %v1063_v47 = vmul.f32 %v1059_v43, %v1030_v14 }
 0x20e   : > { %v1067_v49 = vmul.f32 %v2164_v42, %v1060_v44  ;;  %v1068_v50 = vmul.f32 %v2164_v42, %v1061_v45  ;;  %v1069_v51 = vmul.f32 %v2164_v42, %v1062_v46  ;;  %v1070_v52 = vmul.f32 %v2164_v42, %v1063_v47 }
 0x210   : > { %v1074_v53 = vadd.f32 %v2165_v48, %v1067_v49  ;;  %v1075_v54 = vadd.f32 %v2165_v48, %v1068_v50  ;;  %v1076_v55 = vadd.f32 %v2165_v48, %v1069_v51  ;;  %v1077_v56 = vadd.f32 %v2165_v48, %v1070_v52 }
 0x212   : > { %vm1078_vm6 = vcmp.ge.f32.partialorder %v1074_v53, 0.0  ;;  %vm1079_vm7 = vcmp.ge.f32.partialorder %v1075_v54, 0.0  ;;  %v1082_v57 = vmul.f32 0.2, %v1074_v53  ;;  %v1083_v58 = vmul.f32 0.2, %v1075_v54 }
 0x213   : > { %vm1080_vm14 = vcmp.ge.f32.partialorder %v1076_v55, 0.0  ;;  %v1084_v59 = vmul.f32 0.2, %v1076_v55  ;;  %v1085_v62 = vmul.f32 0.2, %v1077_v56  ;;  %vm1081_vm15 = vcmp.ge.f32.partialorder %v1077_v56, 0.0 }
 0x214   : > { %v2399_v60 = vsel %vm1078_vm6, %v1074_v53, %v1082_v57  ;;  %v2401_v61 = vsel %vm1079_vm7, %v1075_v54, %v1083_v58 }
 0x215   : > { %v1162_v63 = vrot.slane %v2399_v60, 2  ;;  %v1163_v0 = vrot.slane %v2401_v61, 2  ;;  %v1135_v1 = vrot.slane %v2401_v61, 7  ;;  %v1140_v2 = vrot.slane %v2399_v60, 7 }
 0x216   : > { %v1109_v3 = vrot.slane %v2401_v61, 5  ;;  %v1114_v4 = vrot.slane %v2399_v60, 5  ;;  %v1092_v5 = vrot.slane %v2401_v61, 4  ;;  %v1099_v9 = vrot.slane %v2399_v60, 4 }
 0x217   : > { %v1164_v6 = vsel %vm1161_vm8, %v1162_v63, %v1163_v0  ;;  %v1172_v7 = vsel %vm1161_vm8, %v1163_v0, %v1162_v63  ;;  %v1175_v10 = vrot.slane %v2399_v60, 3  ;;  %v1141_v12 = vsel %vm1139_vm9, %v1140_v2, %v1135_v1 }
 0x218   : > { %v2119_v11 = vpack.i.bf16 %v1172_v7, %v1164_v6  ;;  %v1146_v13 = vsel %vm1139_vm9, %v1135_v1, %v1140_v2  ;;  %v1115_v14 = vsel %vm1113_vm10, %v1114_v4, %v1109_v3  ;;  %v1120_v16 = vsel %vm1113_vm10, %v1109_v3, %v1114_v4 }
 0x219   : > { %v2109_v15 = vpack.i.bf16 %v1141_v12, %v1146_v13  ;;  %v2419_v17 = vsel %vm1098_vm11, %v1099_v9, %v1092_v5  ;;  %v2422_v18 = vsel %vm1098_vm11, %v1092_v5, %v1099_v9  ;;  %v2099_v19 = vpack.i.bf16 %v1115_v14, %v1120_v16  ;;  %v2079_v12 = vld [vmem:[%s2384_s26 + $0x78] sm:$0xff]  ;;  %v2070_v13 = vld [vmem:[%s2384_s26 + $0x30] sm:$0xff]  ;;  %v2077_v16 = vld [vmem:[%s2384_s26 + $0x68] sm:$0xff] }
 0x21a   : > { %2120 = vrot.lane.b32.xlu2 %v2119_v11, %s2186_s4  ;;  %v1299_v20 = vpack.c.bf16 %v2422_v18, %v2419_v17  ;;  %v1176_v21 = vrot.slane %v2401_v61, 3  ;;  %v1149_v22 = vrot.slane %v2399_v60, 1  ;;  %v1150_v23 = vrot.slane %v2401_v61, 1  ;;  %v2071_v11 = vld [vmem:[%s2384_s26 + $0x38] sm:$0xff]  ;;  %1476 = vmatpush.bf16.msrb.mxu1 %v2079_v12  ;;  %v2078_v14 = vld [vmem:[%s2384_s26 + $0x70] sm:$0xff] }
 0x21b   : > { %2110 = vrot.lane.b32.xlu1 %v2109_v15, %s2187_s23  ;;  %v1122_v24 = vrot.slane %v2401_v61, 6  ;;  %v1127_v25 = vrot.slane %v2399_v60, 6  ;;  %2100 = vrot.lane.b32.xlu0 %v2099_v19, %s2188_s21  ;;  %v2438_v28 = vsel %vm1080_vm14, %v1076_v55, %v1084_v59  ;;  %v2440_v29 = vsel %vm1081_vm15, %v1077_v56, %v1085_v62  ;;  %v2069_v15 = vld [vmem:[%s2384_s26 + $0x28] sm:$0xff]  ;;  %v2068_v19 = vld [vmem:[%s2384_s26 + $0x20] sm:$0xff] }
 0x21c   : > { %2030 = vmatmul.msk.bf16.vlgmr.msrb.gmra.mxu2 %vm931_vm1, %v1299_v20  ;;  %v1177_v26 = vsel %vm1174_vm12, %v1175_v10, %v1176_v21  ;;  %v1185_v27 = vsel %vm1174_vm12, %v1176_v21, %v1175_v10  ;;  %v1151_v30 = vsel %vm1148_vm13, %v1149_v22, %v1150_v23  ;;  %v1159_v31 = vsel %vm1148_vm13, %v1150_v23, %v1149_v22  ;;  %v2076_v20 = vld [vmem:[%s2384_s26 + $0x60] sm:$0xff]  ;;  %v2067_v21 = vld [vmem:[%s2384_s26 + $0x18] sm:$0xff]  ;;  %v2066_v23 = vld [vmem:[%s2384_s26 + $0x10] sm:$0xff] }
 0x21d   : > { %v1128_v32 = vsel %vm1126_vm0, %v1127_v25, %v1122_v24  ;;  %v1133_v33 = vsel %vm1126_vm0, %v1122_v24, %v1127_v25  ;;  %v2124_v34 = vpack.i.bf16 %v1185_v27, %v1177_v26  ;;  %v2114_v35 = vpack.i.bf16 %v1159_v31, %v1151_v30  ;;  %1457 = vmatpush.bf16.msra.mxu3 %v2071_v11  ;;  %v2075_v22 = vld [vmem:[%s2384_s26 + $0x58] sm:$0xff]  ;;  %v2074_v24 = vld [vmem:[%s2384_s26 + $0x50] sm:$0xff]  ;;  %v2065_v25 = vld [vmem:[%s2384_s26 + $0x8] sm:$0xff] }
 0x21e   : > { %v1136_v36 = vrot.slane %v2440_v29, 7  ;;  %v1142_v37 = vrot.slane %v2438_v28, 7  ;;  %v2104_v38 = vpack.i.bf16 %v1128_v32, %v1133_v33  ;;  %v1123_v39 = vrot.slane %v2440_v29, 6  ;;  %1477 = vmatpush.bf16.msrb.mxu1 %v2078_v14  ;;  %v2073_v26 = vld [vmem:[%s2384_s26 + $0x48] sm:$0xff]  ;;  %v2064_v27 = vld [vmem:[%s2384_s26] sm:$0xff] }
 0x21f   : > { %v1129_v40 = vrot.slane %v2438_v28, 6  ;;  %v1110_v41 = vrot.slane %v2440_v29, 5  ;;  %v1116_v42 = vrot.slane %v2438_v28, 5  ;;  %v1093_v43 = vrot.slane %v2440_v29, 4  ;;  %v2072_v30 = vld [vmem:[%s2384_s26 + $0x40] sm:$0xff]  ;;  %s817_s26 = scalar_lea.vmem %s2638_s16, %s2340_s24  ;;  %s831_s24 = scalar_lea.vmem %s2642_s20, %s2662_s30 }
 0x220   : > { %v1101_v44 = vrot.slane %v2438_v28, 4  ;;  %v1143_v45 = vsel %vm1139_vm9, %v1142_v37, %v1136_v36  ;;  %v1147_v46 = vsel %vm1139_vm9, %v1136_v36, %v1142_v37  ;;  %v1178_v55 = vrot.slane %v2438_v28, 3 }
 0x221   : > { %v1130_v47 = vsel %vm1126_vm0, %v1129_v40, %v1123_v39  ;;  %v1134_v48 = vsel %vm1126_vm0, %v1123_v39, %v1129_v40  ;;  %v1117_v49 = vsel %vm1113_vm10, %v1116_v42, %v1110_v41  ;;  %v1121_v50 = vsel %vm1113_vm10, %v1110_v41, %v1116_v42  ;;  %1458 = vmatpush.bf16.msra.mxu3 %v2070_v13 }
 0x222   : > { %2125 = vrot.lane.b32.xlu2 %v2124_v34, %s2187_s23  ;;  %v2464_v51 = vsel %vm1098_vm11, %v1101_v44, %v1093_v43  ;;  %v2467_v52 = vsel %vm1098_vm11, %v1093_v43, %v1101_v44  ;;  %v2139_v53 = vpack.i.bf16 %v1143_v45, %v1147_v46  ;;  %v2134_v54 = vpack.i.bf16 %v1130_v47, %v1134_v48 }
 0x223   : > { %2115 = vrot.lane.b32.xlu1 %v2114_v35, %s2188_s21  ;;  %2105 = vrot.lane.b32.xlu0 %v2104_v38, %s2186_s4  ;;  %v1179_v56 = vrot.slane %v2440_v29, 3  ;;  %v2129_v57 = vpack.i.bf16 %v1117_v49, %v1121_v50  ;;  %v1302_v58 = vpack.c.bf16 %v2467_v52, %v2464_v51  ;;  %v1165_v59 = vrot.slane %v2438_v28, 2 }
 0x224   : > { %v1166_v62 = vrot.slane %v2440_v29, 2  ;;  %v1152_v63 = vrot.slane %v2438_v28, 1  ;;  %v1153_v0 = vrot.slane %v2440_v29, 1  ;;  %1478 = vmatpush.bf16.msrb.mxu1 %v2077_v16  ;;  %vm1725_vm11 = vcmask 195712  }
 0x225   : > { %v1180_v1 = vsel %vm1174_vm12, %v1178_v55, %v1179_v56  ;;  %v1186_v2 = vsel %vm1174_vm12, %v1179_v56, %v1178_v55  ;;  %1459 = vmatpush.bf16.msra.mxu3 %v2069_v15  ;;  %vm1729_vm12 = vcmask 261312  }
 0x226   : > { %v1167_v3 = vsel %vm1161_vm8, %v1165_v59, %v1166_v62  ;;  %v1173_v4 = vsel %vm1161_vm8, %v1166_v62, %v1165_v59  ;;  %v1154_v5 = vsel %vm1148_vm13, %v1152_v63, %v1153_v0  ;;  %v1160_v6 = vsel %vm1148_vm13, %v1153_v0, %v1152_v63 }
 0x227   : > { %v2154_v7 = vpack.i.bf16 %v1186_v2, %v1180_v1  ;;  %v2149_v9 = vpack.i.bf16 %v1173_v4, %v1167_v3  ;;  %v2144_v10 = vpack.i.bf16 %v1160_v6, %v1154_v5  ;;  %vm1732_vm13 = vcmask 253952  }
 0x228   : > { %1479 = vmatpush.bf16.msrb.mxu1 %v2076_v20 }
 0x229   : > { %1460 = vmatpush.bf16.msra.mxu3 %v2068_v19 }
 0x22a   : > { %2140 = vrot.lane.b32.xlu2 %v2139_v53, %s2187_s23 }
 0x22b   : > { %2135 = vrot.lane.b32.xlu1 %v2134_v54, %s2186_s4  ;;  %2130 = vrot.lane.b32.xlu0 %v2129_v57, %s2188_s21 }
 0x22c   : > { %2031 = vmatmul.msk.bf16.gmra.mxu2 %vm931_vm1, %v1302_v58  ;;  %1480 = vmatpush.bf16.msrb.mxu1 %v2075_v22 }
 0x22d   : > { %1461 = vmatpush.bf16.msra.mxu3 %v2067_v21 }
 0x230   : > { %1481 = vmatpush.bf16.msrb.mxu1 %v2074_v24 }
 0x231   : > { %1462 = vmatpush.bf16.msra.mxu3 %v2066_v23 }
 0x232   : > { %2155 = vrot.lane.b32.xlu2 %v2154_v7, %s2187_s23  ;;  %s812_s23 = scalar_lea.vmem %s2637_s15, %s2662_s30 }
 0x233   : > { %2150 = vrot.lane.b32.xlu1 %v2149_v9, %s2186_s4  ;;  %2145 = vrot.lane.b32.xlu0 %v2144_v10, %s2188_s21 }
 0x234   : > { %1482 = vmatpush.bf16.msrb.mxu1 %v2073_v26 }
 0x235   : > { %1463 = vmatpush.bf16.msra.mxu3 %v2065_v25 }
 0x238   : > { %1483 = vmatpush.bf16.msrb.mxu1 %v2072_v30 }
 0x239   : > { %1464 = vmatpush.bf16.msra.mxu3 %v2064_v27 }
 0x274   : > { %v2121_v31 = vpop.permute.xlu2 %2120 }
 0x275   : > { %v2123_v37 = vunpack.i.h.bf16 %v2121_v31  ;;  %v2122_v38 = vunpack.i.l.bf16 %v2121_v31 }
 0x27c   : > { %v2126_v34 = vpop.permute.xlu2 %2125 }
 0x27d   : > { %v2128_v40 = vunpack.i.h.bf16 %v2126_v34  ;;  %v2127_v41 = vunpack.i.l.bf16 %v2126_v34 }
 0x284   : > { %v2141_v1 = vpop.permute.xlu2 %2140 }
 0x285   : > { %v2143_v14 = vunpack.i.h.bf16 %v2141_v1  ;;  %v2142_v15 = vunpack.i.l.bf16 %v2141_v1 }
 0x28c   : > { %v2156_v16 = vpop.permute.xlu2 %2155 }
 0x28d   : > { %v2111_v32 = vpop.permute.xlu1 %2110  ;;  %v2101_v33 = vpop.permute.xlu0 %2100  ;;  %v2157_v25 = vunpack.i.l.bf16 %v2156_v16 }
 0x28e   : > { %v2103_v35 = vunpack.i.h.bf16 %v2101_v33  ;;  %v2102_v36 = vunpack.i.l.bf16 %v2101_v33  ;;  %v2113_v45 = vunpack.i.h.bf16 %v2111_v32  ;;  %v2112_v46 = vunpack.i.l.bf16 %v2111_v32 }
 0x290   : > { %v1271_v49 = vsel %vm931_vm1, %v2422_v18, %v2102_v36  ;;  %v1272_v50 = vsel %vm931_vm1, %v2419_v17, %v2103_v35 }
 0x295   : > { %v2116_v39 = vpop.permute.xlu1 %2115  ;;  %v2106_v44 = vpop.permute.xlu0 %2105 }
 0x296   : > { %v2118_v42 = vunpack.i.h.bf16 %v2116_v39  ;;  %v2117_v43 = vunpack.i.l.bf16 %v2116_v39  ;;  %v2108_v47 = vunpack.i.h.bf16 %v2106_v44  ;;  %v2107_v48 = vunpack.i.l.bf16 %v2106_v44 }
 0x298   : > { %v1286_v53 = vsel %vm931_vm1, %v2401_v61, %v2118_v42  ;;  %v1285_v54 = vsel %vm931_vm1, %v2399_v60, %v2117_v43  ;;  %v1276_v55 = vsel %vm1275_vm2, %v1271_v49, %v2107_v48  ;;  %v1277_v56 = vsel %vm1275_vm2, %v1272_v50, %v2108_v47  ;;  %v2166_v42 = vld [vmem:[%s2660_s5] ss:$0 sm:$0xff]  ;;  %s820_s5 = scalar_lea.vmem %s2639_s17, %s2662_s30 }
 0x299   : > { %v1289_v57 = vsel %vm1275_vm2, %v1285_v54, %v2122_v38  ;;  %v1290_v58 = vsel %vm1275_vm2, %v1286_v53, %v2123_v37  ;;  %v1281_v59 = vsel %vm1280_vm3, %v1276_v55, %v2112_v46  ;;  %v1282_v18 = vsel %vm1280_vm3, %v1277_v56, %v2113_v45 }
 0x29a   : > { %v1293_v17 = vsel %vm1280_vm3, %v1289_v57, %v2127_v41  ;;  %v1294_v62 = vsel %vm1280_vm3, %v1290_v58, %v2128_v40  ;;  %v1297_v63 = vpack.c.bf16 %v1282_v18, %v1281_v59 }
 0x29b   : > { %v1298_v0 = vpack.c.bf16 %v1294_v62, %v1293_v17 }
 0x29c   : > { %1465 = vmatmul.bf16.vlgmr.msra.gmra.mxu3 %v1297_v63 }
 0x29d   : > { %v2136_v2 = vpop.permute.xlu1 %2135  ;;  %1484 = vmatmul.bf16.vlgmr.msrb.gmra.mxu1 %v1298_v0  ;;  %v2131_v3 = vpop.permute.xlu0 %2130 }
 0x29e   : > { %v2133_v4 = vunpack.i.h.bf16 %v2131_v3  ;;  %v2132_v5 = vunpack.i.l.bf16 %v2131_v3  ;;  %v2138_v6 = vunpack.i.h.bf16 %v2136_v2  ;;  %v2137_v7 = vunpack.i.l.bf16 %v2136_v2 }
 0x29f   : > { %v1504_v37 = vpop.f32.mrf.mxu2 }
 0x2a0   : > { %v1274_v9 = vsel %vm931_vm1, %v2464_v51, %v2133_v4  ;;  %v1273_v10 = vsel %vm931_vm1, %v2467_v52, %v2132_v5  ;;  %v2158_v52 = vunpack.i.h.bf16 %v2156_v16 }
 0x2a1   : > { %v1278_v12 = vsel %vm1275_vm2, %v1273_v10, %v2137_v7  ;;  %v1279_v13 = vsel %vm1275_vm2, %v1274_v9, %v2138_v6 }
 0x2a2   : > { %v1283_v51 = vsel %vm1280_vm3, %v1278_v12, %v2142_v15  ;;  %v1284_v24 = vsel %vm1280_vm3, %v1279_v13, %v2143_v14 }
 0x2a3   : > { %v1300_v32 = vpack.c.bf16 %v1284_v24, %v1283_v51 }
 0x2a5   : > { %v2151_v11 = vpop.permute.xlu1 %2150  ;;  %v2146_v21 = vpop.permute.xlu0 %2145 }
 0x2a6   : > { %v2153_v19 = vunpack.i.h.bf16 %v2151_v11  ;;  %v2152_v20 = vunpack.i.l.bf16 %v2151_v11  ;;  %v2148_v22 = vunpack.i.h.bf16 %v2146_v21  ;;  %v2147_v23 = vunpack.i.l.bf16 %v2146_v21 }
 0x2a7   : > { %v1506_v40 = vpop.f32.mrf.mxu2 }
 0x2a8   : > { %v1288_v26 = vsel %vm931_vm1, %v2440_v29, %v2148_v22  ;;  %v1287_v27 = vsel %vm931_vm1, %v2438_v28, %v2147_v23 }
 0x2a9   : > { %v1291_v30 = vsel %vm1275_vm2, %v1287_v27, %v2152_v20  ;;  %v1292_v31 = vsel %vm1275_vm2, %v1288_v26, %v2153_v19 }
 0x2aa   : > { %v1295_v33 = vsel %vm1280_vm3, %v1291_v30, %v2157_v25  ;;  %v1296_v34 = vsel %vm1280_vm3, %v1292_v31, %v2158_v52 }
 0x2ab   : > { %v1301_v35 = vpack.c.bf16 %v1296_v34, %v1295_v33  ;;  %v2083_v34 = vld [vmem:[%s817_s26 + $0x8] sm:$0xff] }
 0x2ac   : > { %1470 = vmatmul.bf16.gmra.mxu3 %v1300_v32  ;;  %1635 = vmatpush.bf16.msrb.mxu0 %v2083_v34 }
 0x2ad   : > { %1489 = vmatmul.bf16.gmra.mxu1 %v1301_v35  ;;  %v2085_v35 = vld [vmem:[%s825_s0 + $0x8] sm:$0xff] }
 0x2ae   : > { %1679 = vmatpush.bf16.msrb.mxu3 %v2085_v35 }
 0x2af   : > { %v1509_v49 = vpop.f32.mrf.mxu2 }
 0x2b7   : > { %v1511_v0 = vpop.f32.mrf.mxu2 }
 0x31a   : > { %v1485_v36 = vpop.f32.mrf.mxu1 }
 0x31f   : > { %v1466_v38 = vpop.f32.mrf.mxu3 }
 0x320   : > { %v1467_v44 = vadd.f32 %v2166_v42, %v1466_v38  ;;  %v2084_v38 = vld [vmem:[%s825_s0] sm:$0xff] }
 0x321   : > { %1680 = vmatpush.bf16.msrb.mxu3 %v2084_v38 }
 0x322   : > { %v1487_v39 = vpop.f32.mrf.mxu1  ;;  %v1486_v50 = vadd.f32 %v1485_v36, %v1467_v44 }
 0x324   : > { %v1505_v55 = vadd.f32 %v1504_v37, %v1486_v50  ;;  %v2082_v37 = vld [vmem:[%s817_s26] sm:$0xff] }
 0x325   : > { %1636 = vmatpush.bf16.msrb.mxu0 %v2082_v37 }
 0x326   : > { %v1516_v17 = vsel %vm931_vm1, %v1505_v55, 0.0 }
 0x327   : > { %v1468_v41 = vpop.f32.mrf.mxu3 }
 0x328   : > { %v1469_v43 = vadd.f32 %v2166_v42, %v1468_v41 }
 0x32a   : > { %v1490_v45 = vpop.f32.mrf.mxu1  ;;  %v1488_v47 = vadd.f32 %v1487_v39, %v1469_v43  ;;  %v1648_v39 = vld [vmem:[%s2629_s7] sm:$0x3] }
 0x32b   : > { %v1649_v41 = vpack.c.bf16 %v1648_v39, %v1648_v39 }
 0x32c   : > { %v1507_v54 = vadd.f32 %v1506_v40, %v1488_v47 }
 0x32d   : > { %2050 = vmatmul.msk.bf16.vlgmr.msrb.gmra.mxu3 %vm931_vm1, %v1649_v41 }
 0x32e   : > { %v1517_v58 = vsel %vm931_vm1, %v1507_v54, 0.0 }
 0x32f   : > { %v1471_v46 = vpop.f32.mrf.mxu3  ;;  %v1518_v1 = vadd.f32 %v1517_v58, %v1516_v17 }
 0x330   : > { %v1472_v48 = vadd.f32 %v2166_v42, %v1471_v46 }
 0x332   : > { %v1491_v53 = vadd.f32 %v1490_v45, %v1472_v48  ;;  %v1492_v18 = vpop.f32.mrf.mxu1 }
 0x334   : > { %v1510_v56 = vadd.f32 %v1509_v49, %v1491_v53 }
 0x336   : > { %v1519_v62 = vsel %vm931_vm1, %v1510_v56, 0.0 }
 0x337   : > { %v1473_v57 = vpop.f32.mrf.mxu3  ;;  %v1520_v3 = vadd.f32 %v1519_v62, %v1518_v1 }
 0x338   : > { %v1474_v59 = vadd.f32 %v2166_v42, %v1473_v57 }
 0x33a   : > { %v1493_v63 = vadd.f32 %v1492_v18, %v1474_v59 }
 0x33c   : > { %v1512_v2 = vadd.f32 %v1511_v0, %v1493_v63 }
 0x33e   : > { %v1521_v4 = vsel %vm931_vm1, %v1512_v2, 0.0 }
 0x33f   : > { %v1522_v5 = vadd.f32 %v1521_v4, %v1520_v3 }
 0x341   : > { %v1523_v6 = vrot.slane %v1522_v5, 4 }
 0x343   : > { %v1524_v7 = vadd.f32 %v1523_v6, %v1522_v5 }
 0x345   : > { %v1525_v9 = vrot.slane %v1524_v7, 2 }
 0x347   : > { %v1526_v10 = vadd.f32 %v1525_v9, %v1524_v7 }
 0x349   : > { %v1527_v11 = vrot.slane %v1526_v10, 1 }
 0x34b   : > { %v1528_v12 = vadd.f32 %v1527_v11, %v1526_v10 }
 0x34d   : > { %v1529_v13 = vmul.f32 %v1528_v12, %v2373_v8 }
 0x34f   : > { %v1530_v14 = vsub.f32 %v1505_v55, %v1529_v13  ;;  %v1531_v15 = vsub.f32 %v1507_v54, %v1529_v13  ;;  %v1532_v16 = vsub.f32 %v1510_v56, %v1529_v13  ;;  %v1533_v19 = vsub.f32 %v1512_v2, %v1529_v13  ;;  %v2168_v56 = vld [vmem:[%s812_s23] ss:$0 sm:$0xff] }
 0x351   : > { %v1534_v20 = vmul.f32 %v1530_v14, %v1530_v14  ;;  %v1535_v21 = vmul.f32 %v1531_v15, %v1531_v15  ;;  %v1536_v22 = vmul.f32 %v1532_v16, %v1532_v16  ;;  %v1537_v23 = vmul.f32 %v1533_v19, %v1533_v19 }
 0x353   : > { %v1538_v51 = vsel %vm931_vm1, %v1534_v20, 0.0  ;;  %v1539_v24 = vsel %vm931_vm1, %v1535_v21, 0.0  ;;  %v1541_v25 = vsel %vm931_vm1, %v1536_v22, 0.0  ;;  %v1543_v27 = vsel %vm931_vm1, %v1537_v23, 0.0 }
 0x354   : > { %v1540_v52 = vadd.f32 %v1539_v24, %v1538_v51  ;;  %v2169_v51 = vld [vmem:[%s828_s3] ss:$0 sm:$0xff] }
 0x356   : > { %v1542_v26 = vadd.f32 %v1541_v25, %v1540_v52 }
 0x358   : > { %v1544_v30 = vadd.f32 %v1543_v27, %v1542_v26 }
 0x35a   : > { %v1545_v31 = vrot.slane %v1544_v30, 4 }
 0x35c   : > { %v1546_v32 = vadd.f32 %v1545_v31, %v1544_v30 }
 0x35e   : > { %v1547_v33 = vrot.slane %v1546_v32, 2 }
 0x360   : > { %v1548_v36 = vadd.f32 %v1547_v33, %v1546_v32 }
 0x362   : > { %v1549_v40 = vrot.slane %v1548_v36, 1 }
 0x364   : > { %v1550_v42 = vadd.f32 %v1549_v40, %v1548_v36 }
 0x366   : > { %v1551_v43 = vmul.f32 %v1550_v42, %v2373_v8  ;;  %v2167_v8 = vld [vmem:[%s809_s29] ss:$0 sm:$0xff] }
 0x368   : > { %v1552_v44 = vadd.f32 1e-05, %v1551_v43 }
 0x36a   : > { %2175 = vrsqrt.f32 %v1552_v44  ;;  %vm1559_vm5 = vweird.f32 %v1552_v44 }
 0x370   : > { %v2176_v45 = vpop.eup %2175 }
 0x371   : > { %v1554_v46 = vmul.f32 %v2176_v45, %v1552_v44  ;;  %vm1560_vm4 = vweird.f32 %v2176_v45  ;;  %v1716_v44 = vlaneseq }
 0x372   : > { %vm1561_vm6 = vmor %vm1559_vm5, %vm1560_vm4 }
 0x373   : > { %v1555_v47 = vmul.f32 %v2176_v45, %v1554_v46 }
 0x375   : > { %v1556_v48 = vmul.f32 0.5, %v1555_v47  ;;  %v1717_v47 = vand.u32 127, %v1716_v44 }
 0x377   : > { %v1557_v49 = vsub.f32 1.5, %v1556_v48 }
 0x379   : > { %v1558_v50 = vmul.f32 %v2176_v45, %v1557_v49  ;;  %v1719_v49 = vadd.s32 4294967288, %v1717_v47 }
 0x37b   : > { %v1562_v53 = vsel %vm1561_vm6, %v2176_v45, %v1558_v50 }
 0x37c   : > { %v1563_v54 = vmul.f32 %v1562_v53, %v1530_v14  ;;  %v1564_v55 = vmul.f32 %v1562_v53, %v1531_v15  ;;  %v1566_v57 = vmul.f32 %v1562_v53, %v1533_v19  ;;  %v1565_v58 = vmul.f32 %v1562_v53, %v1532_v16 }
 0x37e   : > { %v1570_v59 = vmul.f32 %v2167_v8, %v1563_v54  ;;  %v1571_v18 = vmul.f32 %v2167_v8, %v1564_v55  ;;  %v1573_v63 = vmul.f32 %v2167_v8, %v1566_v57  ;;  %v1572_v0 = vmul.f32 %v2167_v8, %v1565_v58 }
 0x37f   : > { %v1723_v8 = vadd.s32 4294967280, %v1717_v47 }
 0x380   : > { %v1577_v17 = vadd.f32 %v2168_v56, %v1570_v59  ;;  %v1578_v62 = vadd.f32 %v2168_v56, %v1571_v18  ;;  %v1579_v7 = vadd.f32 %v2168_v56, %v1572_v0  ;;  %v1580_v9 = vadd.f32 %v2168_v56, %v1573_v63 }
 0x381   : > { %v1727_v56 = vadd.s32 4294967272, %v1717_v47 }
 0x382   : > { %vm1581_vm7 = vcmp.ge.f32.partialorder %v1577_v17, 0.0  ;;  %vm1582_vm8 = vcmp.ge.f32.partialorder %v1578_v62, 0.0  ;;  %v1585_v1 = vmul.f32 0.2, %v1577_v17  ;;  %v1586_v2 = vmul.f32 0.2, %v1578_v62 }
 0x383   : > { %v1587_v13 = vmul.f32 0.2, %v1579_v7  ;;  %v1588_v14 = vmul.f32 0.2, %v1580_v9  ;;  %vm1583_vm9 = vcmp.ge.f32.partialorder %v1579_v7, 0.0  ;;  %vm1584_vm10 = vcmp.ge.f32.partialorder %v1580_v9, 0.0 }
 0x384   : > { %v1589_v3 = vsel %vm1581_vm7, %v1577_v17, %v1585_v1  ;;  %v1590_v4 = vsel %vm1582_vm8, %v1578_v62, %v1586_v2 }
 0x385   : > { %v1593_v5 = vadd.f32 %v1589_v3, %v2399_v60  ;;  %v1594_v6 = vadd.f32 %v1590_v4, %v2401_v61  ;;  %v1591_v15 = vsel %vm1583_vm9, %v1579_v7, %v1587_v13  ;;  %v1592_v16 = vsel %vm1584_vm10, %v1580_v9, %v1588_v14 }
 0x386   : > { %v1595_v19 = vadd.f32 %v1591_v15, %v2438_v28  ;;  %v1596_v60 = vadd.f32 %v1592_v16, %v2440_v29  ;;  %v2170_v28 = vld [vmem:[%s820_s5] ss:$0 sm:$0xff] }
 0x387   : > { %v1597_v10 = vmul.f32 0.70710677, %v1593_v5  ;;  %v1598_v11 = vmul.f32 0.70710677, %v1594_v6 }
 0x388   : > { %v1599_v61 = vmul.f32 0.70710677, %v1595_v19  ;;  %v1600_v20 = vmul.f32 0.70710677, %v1596_v60 }
 0x389   : > { %v1601_v12 = vpack.c.bf16 %v1598_v11, %v1597_v10 }
 0x38a   : > { %v1602_v21 = vpack.c.bf16 %v1600_v20, %v1599_v61 }
 0x38b   : > { %2040 = vmatmul.msk.bf16.vlgmr.msrb.gmra.mxu0 %vm931_vm1, %v1601_v12 }
 0x39b   : > { %2041 = vmatmul.msk.bf16.gmra.mxu0 %vm931_vm1, %v1602_v21  ;;  %vm1721_vm1 = vcmask 130112  }
 0x3b0   : > { %v1682_v22 = vpop.f32.mrf.mxu3 }
 0x3b1   : > { %v1683_v24 = vadd.f32 %v2169_v51, %v1682_v22 }
 0x3b3   : > { %v1688_v52 = vperm.slane %v1683_v24, 0  ;;  %v1687_v32 = vrot.slane %v1683_v24, 1 }
 0x3b5   : > { %v1689_v35 = vperm.slane %v1687_v32, 0 }
 0x3b8   : > { %v1684_v23 = vpop.f32.mrf.mxu3 }
 0x408   : > { %v1638_v29 = vpop.f32.mrf.mxu0 }
 0x409   : > { %v1639_v25 = vadd.f32 %v2170_v28, %v1638_v29 }
 0x40b   : > { %v1692_v26 = vmul.f32 %v1688_v52, %v1639_v25 }
 0x40d   : > { %v1696_v27 = vsel %vm1275_vm2, %v1692_v26, 0.0 }
 0x40e   : > { %1697 = vadd.xlane.f32.xlu0 %v1696_v27 }
 0x410   : > { %v1640_v30 = vpop.f32.mrf.mxu0 }
 0x411   : > { %v1641_v31 = vadd.f32 %v2170_v28, %v1640_v30 }
 0x413   : > { %v1693_v33 = vmul.f32 %v1688_v52, %v1641_v31 }
 0x415   : > { %v1699_v34 = vsel %vm1275_vm2, %v1693_v33, 0.0 }
 0x416   : > { %1700 = vadd.xlane.f32.xlu1 %v1699_v34 }
 0x418   : > { %v1643_v36 = vpop.f32.mrf.mxu0 }
 0x419   : > { %v1644_v37 = vadd.f32 %v2170_v28, %v1643_v36 }
 0x41b   : > { %v1694_v38 = vmul.f32 %v1689_v35, %v1644_v37 }
 0x41d   : > { %v1702_v39 = vsel %vm1275_vm2, %v1694_v38, 0.0 }
 0x41e   : > { %1703 = vadd.xlane.f32.xlu2 %v1702_v39 }
 0x420   : > { %v1645_v40 = vpop.f32.mrf.mxu0 }
 0x421   : > { %v1646_v41 = vadd.f32 %v2170_v28, %v1645_v40 }
 0x423   : > { %v1695_v42 = vmul.f32 %v1689_v35, %v1646_v41 }
 0x425   : > { %v1705_v43 = vsel %vm1275_vm2, %v1695_v42, 0.0 }
 0x426   : > { %1706 = vadd.xlane.f32.xlu2 %v1705_v43 }
 0x481   : > { %v1698_v48 = vpop.xlane.xlu0 %1697 }
 0x482   : > { %v1708_v54 = vmul.f32 0.125, %v1698_v48 }
 0x484   : > { %v1718_v59 = vperm.slane %v1708_v54, %v1717_v47 }
 0x489   : > { %v1701_v45 = vpop.xlane.xlu1 %1700 }
 0x48a   : > { %v1709_v50 = vmul.f32 0.125, %v1701_v45 }
 0x48c   : > { %v1720_v55 = vperm.slane %v1709_v50, %v1719_v49 }
 0x48e   : > { %v1722_v17 = vsel %vm1721_vm1, %v1720_v55, %v1718_v59 }
 0x491   : > { %v1704_v46 = vpop.xlane.xlu2 %1703 }
 0x492   : > { %v1710_v53 = vmul.f32 0.125, %v1704_v46 }
 0x494   : > { %v1724_v57 = vperm.slane %v1710_v53, %v1723_v8 }
 0x496   : > { %v1726_v63 = vsel %vm1725_vm11, %v1724_v57, %v1722_v17 }
 0x499   : > { %v1707_v58 = vpop.xlane.xlu2 %1706 }
 0x49a   : > { %v1711_v18 = vmul.f32 0.125, %v1707_v58 }
 0x49c   : > { %v1728_v62 = vperm.slane %v1711_v18, %v1727_v56 }
 0x49e   : > { %v1730_v0 = vsel %vm1729_vm12, %v1728_v62, %v1726_v63 }
 0x49f   : > { %1733 = vst.msk [vmem:[%s831_s24] sm:$0x1] %vm1732_vm13, %v1730_v0 }
 0x4a0 PF: > { %s30_s1 = sadd.s32 1, %s2183_s1  }
 0x4a1   : > { %p27_p4 = scmp.ge.s32.totalorder %s30_s1, 7  }
 0x4a3   :  { %29 = sbr.rel (!%p27_p4) target bundleno = 7 (0x7), region = 169 }

</bundles_post_ra>
